<compile_context>
chip_gen: v5e
topology: v5e:2x2
jax: 0.10.0
libtpu: 0.0.40
codegen_flags: <defaults>
</compile_context>

<pallas_src>
import math

import jax
import jax.numpy as jnp
from jax.experimental import pallas as pl
from jax.experimental.pallas import tpu as pltpu

LOG_STD_MAX = 2.0
LOG_STD_MIN = -20.0
_HALF_LOG_2PI = 0.5 * math.log(2.0 * math.pi)
_LOG2 = math.log(2.0)


# --------------------------------------------------------------- fused kernel
def make_actor_kernel(n_lstm_layers, seq_len):
    """Builds the fused forward kernel.

    Ref order (inputs, output, scratch):
      x_ref                                   (T, Bp, n_state)
      per LSTM layer: wih (I, 4H), whh (H, 4H), b (1, 4H)   [packed gates i|f|g|o]
      w1 (F, L), b1 (1, L), w2 (L, L), b2, w3 (L, L), b3,
      w_head (L, 2A), b_head (1, 2A)          [mu | sigma packed]
      eps (Bp, A)
      out_ref (Bp, 4*A)                       packed [mu | std | action | logp]
      ys_ref  (T*Bp, H)                       VMEM scratch: per-step outputs of
                                              layer l feeding layer l+1
    """

    def kernel(*refs):
        it = iter(refs)
        x_ref = next(it)
        layers = [(next(it), next(it), next(it)) for _ in range(n_lstm_layers)]
        w1, b1, w2, b2, w3, b3, whead, bhead = (next(it) for _ in range(8))
        eps_ref = next(it)
        out_ref = next(it)
        ys_ref = next(it)

        T = seq_len
        Bp = x_ref.shape[1]

        h_lasts = []
        for li, (wih_ref, whh_ref, b_ref) in enumerate(layers):
            H = whh_ref.shape[0]
            whh = whh_ref[...]                     # (H, 4H) packed gates
            bb = b_ref[...]                        # (1, 4H)

            if li == 0:
                # Layout-free merge of leading dims; no per-step loads/concat.
                xin = x_ref[...].reshape(T * Bp, x_ref.shape[2])
            else:
                xin = ys_ref[...]                  # (T*Bp, H) previous layer seq

            # Hoisted input projection: ONE packed matmul per layer.
            xg = jnp.dot(xin, wih_ref[...],
                         preferred_element_type=jnp.float32) + bb   # (T*Bp, 4H)

            # Recurrence, fully unrolled (T static); h/c stay in vregs.
            h = jnp.zeros((Bp, H), jnp.float32)
            c = jnp.zeros((Bp, H), jnp.float32)
            last_layer = (li + 1 == n_lstm_layers)
            for t in range(T):
                lo = t * Bp                        # static, multiple of 8
                pre = xg[lo:lo + Bp] + jnp.dot(
                    h, whh, preferred_element_type=jnp.float32)      # (Bp, 4H)
                sg = jax.nn.sigmoid(pre)           # one wide EUP push (i|f|-|o)
                g_g = jnp.tanh(pre[:, 2 * H:3 * H])
                i_g = sg[:, 0:H]
                f_g = sg[:, H:2 * H]
                o_g = sg[:, 3 * H:4 * H]
                c = f_g * c + i_g * g_g
                h = o_g * jnp.tanh(c)
                if not last_layer:
                    # Aligned (8, H) store to scratch; bounds vreg live ranges.
                    ys_ref[lo:lo + Bp, :] = h
            h_lasts.append(h)

        # extract_states: concat of final hidden state of every layer.
        feats = jnp.concatenate(h_lasts, axis=-1)                    # (Bp, layers*H)

        # ----- ActionModule: 3x(Linear+ReLU) -> fused mu/sigma head -> rsample
        h1 = jnp.maximum(
            jnp.dot(feats, w1[...], preferred_element_type=jnp.float32) + b1[...], 0.0)
        h2 = jnp.maximum(
            jnp.dot(h1, w2[...], preferred_element_type=jnp.float32) + b2[...], 0.0)
        h3 = jnp.maximum(
            jnp.dot(h2, w3[...], preferred_element_type=jnp.float32) + b3[...], 0.0)

        head = jnp.dot(h3, whead[...], preferred_element_type=jnp.float32) + bhead[...]
        A = head.shape[1] // 2
        mu = head[:, 0:A]
        sigma = head[:, A:2 * A]

        log_std = jnp.clip(sigma, LOG_STD_MIN, LOG_STD_MAX)
        std = jnp.exp(log_std)

        # rsample: mu + std * eps (eps ~ N(0,1), supplied host-side)
        ga = mu + std * eps_ref[...]
        action = jnp.tanh(ga)

        # torch semantics: log_prob of gaussian_action[0] (first batch row),
        # broadcast against the whole-batch distribution -> (Bp, A).
        # Well-conditioned form: z = (ga0 - mu) / std computed via exp(-log_std).
        ga0 = ga[0:1, :]
        z = (ga0 - mu) * jnp.exp(-log_std)
        logp = -0.5 * z * z - log_std - _HALF_LOG_2PI
        logp = logp - 2.0 * (_LOG2 - ga0 - jax.nn.softplus(-2.0 * ga0))

        # Single packed output store.
        out_ref[...] = jnp.concatenate([mu, std, action, logp], axis=-1)

    return kernel


# ------------------------------------------------------------------- wrapper
def actor_network_forward(s, lstm_params, mlp_params, eps):
    """s: (T, B, n_state) time-major. Returns (mu, action_std, action, log_prob)."""
    T, B, _ = s.shape
    A = mlp_params["w_mu"].shape[1]
    H = lstm_params[0]["w_hh"].shape[2]
    n_layers = len(lstm_params)

    # Pad batch to a multiple of 8 sublanes (vreg-friendly). Padded rows are
    # sliced off afterwards; row 0 (which drives logp) is always a real row.
    Bp = max(8, -(-B // 8) * 8)
    if Bp != B:
        s = jnp.pad(s, ((0, 0), (0, Bp - B), (0, 0)))
        eps = jnp.pad(eps, ((0, Bp - B), (0, 0)))

    args = [s]
    for layer in lstm_params:
        # Pack the 4 gates along the output (lane) dim: (I,4H) / (H,4H) / (1,4H).
        args.append(jnp.concatenate([layer["w_ih"][g] for g in range(4)], axis=-1))
        args.append(jnp.concatenate([layer["w_hh"][g] for g in range(4)], axis=-1))
        args.append(jnp.concatenate([layer["b"][g] for g in range(4)], axis=-1))
    args += [mlp_params[k] for k in ("w1", "b1", "w2", "b2", "w3", "b3")]
    # Fused mu/sigma head: (L, 2A) weight, (1, 2A) bias.
    args.append(jnp.concatenate([mlp_params["w_mu"], mlp_params["w_sig"]], axis=-1))
    args.append(jnp.concatenate([mlp_params["b_mu"], mlp_params["b_sig"]], axis=-1))
    args.append(eps)

    out = pl.pallas_call(
        make_actor_kernel(n_layers, T),
        out_shape=jax.ShapeDtypeStruct((Bp, 4 * A), jnp.float32),
        scratch_shapes=[pltpu.VMEM((T * Bp, H), jnp.float32)],
    )(*args)

    mu = out[:B, 0:A]
    std = out[:B, A:2 * A]
    action = out[:B, 2 * A:3 * A]
    logp = out[:B, 3 * A:4 * A]
    return mu, std, action, logp


# ------------------------------------------------------- pure-JAX reference
def reference_forward(s, lstm_params, mlp_params, eps):
    T, B, _ = s.shape
    x = s
    h_lasts = []
    for layer in lstm_params:
        wih, whh, b = layer["w_ih"], layer["w_hh"], layer["b"]
        H = whh.shape[2]
        h = jnp.zeros((B, H), jnp.float32)
        c = jnp.zeros((B, H), jnp.float32)
        ys = []
        for t in range(T):
            xt = x[t]
            g = [xt @ wih[k] + h @ whh[k] + b[k] for k in range(4)]
            i_g = jax.nn.sigmoid(g[0])
            f_g = jax.nn.sigmoid(g[1])
            g_g = jnp.tanh(g[2])
            o_g = jax.nn.sigmoid(g[3])
            c = f_g * c + i_g * g_g
            h = o_g * jnp.tanh(c)
            ys.append(h)
        x = jnp.stack(ys, axis=0)
        h_lasts.append(h)
    feats = jnp.concatenate(h_lasts, axis=-1)

    relu = lambda v: jnp.maximum(v, 0.0)
    h1 = relu(feats @ mlp_params["w1"] + mlp_params["b1"])
    h2 = relu(h1 @ mlp_params["w2"] + mlp_params["b2"])
    h3 = relu(h2 @ mlp_params["w3"] + mlp_params["b3"])
    mu = h3 @ mlp_params["w_mu"] + mlp_params["b_mu"]
    sigma = h3 @ mlp_params["w_sig"] + mlp_params["b_sig"]
    log_std = jnp.clip(sigma, LOG_STD_MIN, LOG_STD_MAX)
    std = jnp.exp(log_std)
    ga = mu + std * eps
    action = jnp.tanh(ga)
    ga0 = ga[0:1, :]
    logp = -((ga0 - mu) ** 2) / (2.0 * std * std) - log_std - _HALF_LOG_2PI
    logp = logp - 2.0 * (_LOG2 - ga0 - jax.nn.softplus(-2.0 * ga0))
    return mu, std, action, logp


# ------------------------------------------------------------------ __main__
if __name__ == "__main__":
    # synthetic args
    n_state = 8          # LSTM input feature size
    n_rnn_hidden = 16
    n_rnn_layers = 2
    rnn_directions = 1
    n_action = 4
    T, B = 8, 2

    feature_extractor = n_rnn_hidden * n_rnn_layers * rnn_directions   # 32
    last_hidden = feature_extractor * 2                                 # 64

    key = jax.random.PRNGKey(0)
    keys = iter(jax.random.split(key, 32))

    def init(shape, scale=0.1):
        return (scale * jax.random.normal(next(keys), shape)).astype(jnp.float32)

    # LSTM parameters: per-gate (i, f, g, o) weights, pre-transposed to (in, out);
    # bias is the per-gate sum b_ih + b_hh.  (Packing along lanes happens in the
    # wrapper.)
    lstm_params = []
    in_sz = n_state
    for _ in range(n_rnn_layers):
        lstm_params.append({
            "w_ih": init((4, in_sz, n_rnn_hidden)),
            "w_hh": init((4, n_rnn_hidden, n_rnn_hidden)),
            "b":    init((4, 1, n_rnn_hidden)),
        })
        in_sz = n_rnn_hidden

    # ActionModule parameters
    mlp_params = {
        "w1": init((feature_extractor, last_hidden)), "b1": init((1, last_hidden)),
        "w2": init((last_hidden, last_hidden)),       "b2": init((1, last_hidden)),
        "w3": init((last_hidden, last_hidden)),       "b3": init((1, last_hidden)),
        "w_mu": init((last_hidden, n_action)),        "b_mu": init((1, n_action)),
        "w_sig": init((last_hidden, n_action)),       "b_sig": init((1, n_action)),
    }

    # inputs
    s = jax.random.normal(next(keys), (T, B, n_state), dtype=jnp.float32)
    eps = jax.random.normal(next(keys), (B, n_action), dtype=jnp.float32)  # rsample noise

    mu, sigma, action, log_prob = actor_network_forward(s, lstm_params, mlp_params, eps)
    jax.block_until_ready((mu, sigma, action, log_prob))

    # correctness vs pure-JAX reference
    rmu, rsig, ract, rlogp = reference_forward(s, lstm_params, mlp_params, eps)
    for got, ref in ((mu, rmu), (sigma, rsig), (action, ract), (log_prob, rlogp)):
        assert got.shape == (B, n_action)
        assert bool(jnp.all(jnp.isfinite(got)))
        assert bool(jnp.allclose(got, ref, rtol=1e-2, atol=1e-2))

    print("KERNEL_OK")
</pallas_src>

<mosaic_0001>
module attributes {stable_mosaic.version = 11 : i64} {
  func.func @kernel(%arg0: memref<8x8x8xf32, #tpu.memory_space<vmem>>, %arg1: memref<8x64xf32, #tpu.memory_space<vmem>>, %arg2: memref<16x64xf32, #tpu.memory_space<vmem>>, %arg3: memref<1x64xf32, #tpu.memory_space<vmem>>, %arg4: memref<16x64xf32, #tpu.memory_space<vmem>>, %arg5: memref<16x64xf32, #tpu.memory_space<vmem>>, %arg6: memref<1x64xf32, #tpu.memory_space<vmem>>, %arg7: memref<32x64xf32, #tpu.memory_space<vmem>>, %arg8: memref<1x64xf32, #tpu.memory_space<vmem>>, %arg9: memref<64x64xf32, #tpu.memory_space<vmem>>, %arg10: memref<1x64xf32, #tpu.memory_space<vmem>>, %arg11: memref<64x64xf32, #tpu.memory_space<vmem>>, %arg12: memref<1x64xf32, #tpu.memory_space<vmem>>, %arg13: memref<64x8xf32, #tpu.memory_space<vmem>>, %arg14: memref<1x8xf32, #tpu.memory_space<vmem>>, %arg15: memref<8x4xf32, #tpu.memory_space<vmem>>, %arg16: memref<8x16xf32, #tpu.memory_space<vmem>>, %arg17: memref<64x16xf32, #tpu.memory_space<vmem>>) attributes {dimension_semantics = [], scalar_prefetch = 0 : i64, scratch_operands = 1 : i64, tpu.core_type = #tpu.core_type<tc>} {
    %c0 = arith.constant 0 : index
    %c0_0 = arith.constant 0 : index
    %0 = vector.load %arg2[%c0, %c0_0] : memref<16x64xf32, #tpu.memory_space<vmem>>, vector<16x64xf32>
    %c0_1 = arith.constant 0 : index
    %c0_2 = arith.constant 0 : index
    %1 = vector.load %arg3[%c0_1, %c0_2] : memref<1x64xf32, #tpu.memory_space<vmem>>, vector<1x64xf32>
    %c0_3 = arith.constant 0 : index
    %c0_4 = arith.constant 0 : index
    %c0_5 = arith.constant 0 : index
    %2 = vector.load %arg0[%c0_3, %c0_4, %c0_5] : memref<8x8x8xf32, #tpu.memory_space<vmem>>, vector<8x8x8xf32>
    %3 = vector.shape_cast %2 : vector<8x8x8xf32> to vector<64x8xf32>
    %c0_6 = arith.constant 0 : index
    %c0_7 = arith.constant 0 : index
    %4 = vector.load %arg1[%c0_6, %c0_7] : memref<8x64xf32, #tpu.memory_space<vmem>>, vector<8x64xf32>
    %cst = arith.constant dense<0.000000e+00> : vector<64x64xf32>
    %5 = tpu.matmul %3, %4, %cst {dimension_numbers = #tpu.dot_dimension_numbers<[1], [0], [0], [1], [0, 0, 1, 1], [], []>} : vector<64x8xf32>, vector<8x64xf32>, vector<64x64xf32> -> vector<64x64xf32>
    %6 = vector.broadcast %1 : vector<1x64xf32> to vector<64x64xf32>
    %7 = arith.addf %5, %6 : vector<64x64xf32>
    %cst_8 = arith.constant 0.000000e+00 : f32
    %8 = vector.broadcast %cst_8 : f32 to vector<8x16xf32>
    %cst_9 = arith.constant 0.000000e+00 : f32
    %9 = vector.broadcast %cst_9 : f32 to vector<8x16xf32>
    %10 = vector.extract_strided_slice %7 {offsets = [0, 0], sizes = [8, 64], strides = [1, 1]} : vector<64x64xf32> to vector<8x64xf32>
    %cst_10 = arith.constant dense<0.000000e+00> : vector<8x64xf32>
    %11 = tpu.matmul %8, %0, %cst_10 {dimension_numbers = #tpu.dot_dimension_numbers<[1], [0], [0], [1], [0, 0, 1, 1], [], []>} : vector<8x16xf32>, vector<16x64xf32>, vector<8x64xf32> -> vector<8x64xf32>
    %12 = arith.addf %10, %11 : vector<8x64xf32>
    %13 = arith.negf %12 : vector<8x64xf32>
    %14 = math.exp %13 : vector<8x64xf32>
    %cst_11 = arith.constant 1.000000e+00 : f32
    %15 = vector.broadcast %cst_11 : f32 to vector<8x64xf32>
    %16 = arith.addf %15, %14 : vector<8x64xf32>
    %17 = arith.divf %15, %16 : vector<8x64xf32>
    %18 = vector.extract_strided_slice %12 {offsets = [0, 32], sizes = [8, 16], strides = [1, 1]} : vector<8x64xf32> to vector<8x16xf32>
    %19 = math.tanh %18 : vector<8x16xf32>
    %20 = vector.extract_strided_slice %17 {offsets = [0, 0], sizes = [8, 16], strides = [1, 1]} : vector<8x64xf32> to vector<8x16xf32>
    %21 = vector.extract_strided_slice %17 {offsets = [0, 16], sizes = [8, 16], strides = [1, 1]} : vector<8x64xf32> to vector<8x16xf32>
    %22 = vector.extract_strided_slice %17 {offsets = [0, 48], sizes = [8, 16], strides = [1, 1]} : vector<8x64xf32> to vector<8x16xf32>
    %23 = arith.mulf %21, %9 : vector<8x16xf32>
    %24 = arith.mulf %20, %19 : vector<8x16xf32>
    %25 = arith.addf %23, %24 : vector<8x16xf32>
    %26 = math.tanh %25 : vector<8x16xf32>
    %27 = arith.mulf %22, %26 : vector<8x16xf32>
    %c0_12 = arith.constant 0 : index
    %c0_13 = arith.constant 0 : index
    %28 = vector.load %arg17[%c0_12, %c0_13] : memref<64x16xf32, #tpu.memory_space<vmem>>, vector<8x16xf32>
    tpu.vector_store %arg17[%c0_12, %c0_13], %27 {strides = array<i32>} : memref<64x16xf32, #tpu.memory_space<vmem>>, vector<8x16xf32>,
    %29 = vector.extract_strided_slice %7 {offsets = [8, 0], sizes = [8, 64], strides = [1, 1]} : vector<64x64xf32> to vector<8x64xf32>
    %cst_14 = arith.constant dense<0.000000e+00> : vector<8x64xf32>
    %30 = tpu.matmul %27, %0, %cst_14 {dimension_numbers = #tpu.dot_dimension_numbers<[1], [0], [0], [1], [0, 0, 1, 1], [], []>} : vector<8x16xf32>, vector<16x64xf32>, vector<8x64xf32> -> vector<8x64xf32>
    %31 = arith.addf %29, %30 : vector<8x64xf32>
    %32 = arith.negf %31 : vector<8x64xf32>
    %33 = math.exp %32 : vector<8x64xf32>
    %cst_15 = arith.constant 1.000000e+00 : f32
    %34 = vector.broadcast %cst_15 : f32 to vector<8x64xf32>
    %35 = arith.addf %34, %33 : vector<8x64xf32>
    %36 = arith.divf %34, %35 : vector<8x64xf32>
    %37 = vector.extract_strided_slice %31 {offsets = [0, 32], sizes = [8, 16], strides = [1, 1]} : vector<8x64xf32> to vector<8x16xf32>
    %38 = math.tanh %37 : vector<8x16xf32>
    %39 = vector.extract_strided_slice %36 {offsets = [0, 0], sizes = [8, 16], strides = [1, 1]} : vector<8x64xf32> to vector<8x16xf32>
    %40 = vector.extract_strided_slice %36 {offsets = [0, 16], sizes = [8, 16], strides = [1, 1]} : vector<8x64xf32> to vector<8x16xf32>
    %41 = vector.extract_strided_slice %36 {offsets = [0, 48], sizes = [8, 16], strides = [1, 1]} : vector<8x64xf32> to vector<8x16xf32>
    %42 = arith.mulf %40, %25 : vector<8x16xf32>
    %43 = arith.mulf %39, %38 : vector<8x16xf32>
    %44 = arith.addf %42, %43 : vector<8x16xf32>
    %45 = math.tanh %44 : vector<8x16xf32>
    %46 = arith.mulf %41, %45 : vector<8x16xf32>
    %c8 = arith.constant 8 : index
    %c0_16 = arith.constant 0 : index
    %47 = vector.load %arg17[%c8, %c0_16] : memref<64x16xf32, #tpu.memory_space<vmem>>, vector<8x16xf32>
    tpu.vector_store %arg17[%c8, %c0_16], %46 {strides = array<i32>} : memref<64x16xf32, #tpu.memory_space<vmem>>, vector<8x16xf32>,
    %48 = vector.extract_strided_slice %7 {offsets = [16, 0], sizes = [8, 64], strides = [1, 1]} : vector<64x64xf32> to vector<8x64xf32>
    %cst_17 = arith.constant dense<0.000000e+00> : vector<8x64xf32>
    %49 = tpu.matmul %46, %0, %cst_17 {dimension_numbers = #tpu.dot_dimension_numbers<[1], [0], [0], [1], [0, 0, 1, 1], [], []>} : vector<8x16xf32>, vector<16x64xf32>, vector<8x64xf32> -> vector<8x64xf32>
    %50 = arith.addf %48, %49 : vector<8x64xf32>
    %51 = arith.negf %50 : vector<8x64xf32>
    %52 = math.exp %51 : vector<8x64xf32>
    %cst_18 = arith.constant 1.000000e+00 : f32
    %53 = vector.broadcast %cst_18 : f32 to vector<8x64xf32>
    %54 = arith.addf %53, %52 : vector<8x64xf32>
    %55 = arith.divf %53, %54 : vector<8x64xf32>
    %56 = vector.extract_strided_slice %50 {offsets = [0, 32], sizes = [8, 16], strides = [1, 1]} : vector<8x64xf32> to vector<8x16xf32>
    %57 = math.tanh %56 : vector<8x16xf32>
    %58 = vector.extract_strided_slice %55 {offsets = [0, 0], sizes = [8, 16], strides = [1, 1]} : vector<8x64xf32> to vector<8x16xf32>
    %59 = vector.extract_strided_slice %55 {offsets = [0, 16], sizes = [8, 16], strides = [1, 1]} : vector<8x64xf32> to vector<8x16xf32>
    %60 = vector.extract_strided_slice %55 {offsets = [0, 48], sizes = [8, 16], strides = [1, 1]} : vector<8x64xf32> to vector<8x16xf32>
    %61 = arith.mulf %59, %44 : vector<8x16xf32>
    %62 = arith.mulf %58, %57 : vector<8x16xf32>
    %63 = arith.addf %61, %62 : vector<8x16xf32>
    %64 = math.tanh %63 : vector<8x16xf32>
    %65 = arith.mulf %60, %64 : vector<8x16xf32>
    %c16 = arith.constant 16 : index
    %c0_19 = arith.constant 0 : index
    %66 = vector.load %arg17[%c16, %c0_19] : memref<64x16xf32, #tpu.memory_space<vmem>>, vector<8x16xf32>
    tpu.vector_store %arg17[%c16, %c0_19], %65 {strides = array<i32>} : memref<64x16xf32, #tpu.memory_space<vmem>>, vector<8x16xf32>,
    %67 = vector.extract_strided_slice %7 {offsets = [24, 0], sizes = [8, 64], strides = [1, 1]} : vector<64x64xf32> to vector<8x64xf32>
    %cst_20 = arith.constant dense<0.000000e+00> : vector<8x64xf32>
    %68 = tpu.matmul %65, %0, %cst_20 {dimension_numbers = #tpu.dot_dimension_numbers<[1], [0], [0], [1], [0, 0, 1, 1], [], []>} : vector<8x16xf32>, vector<16x64xf32>, vector<8x64xf32> -> vector<8x64xf32>
    %69 = arith.addf %67, %68 : vector<8x64xf32>
    %70 = arith.negf %69 : vector<8x64xf32>
    %71 = math.exp %70 : vector<8x64xf32>
    %cst_21 = arith.constant 1.000000e+00 : f32
    %72 = vector.broadcast %cst_21 : f32 to vector<8x64xf32>
    %73 = arith.addf %72, %71 : vector<8x64xf32>
    %74 = arith.divf %72, %73 : vector<8x64xf32>
    %75 = vector.extract_strided_slice %69 {offsets = [0, 32], sizes = [8, 16], strides = [1, 1]} : vector<8x64xf32> to vector<8x16xf32>
    %76 = math.tanh %75 : vector<8x16xf32>
    %77 = vector.extract_strided_slice %74 {offsets = [0, 0], sizes = [8, 16], strides = [1, 1]} : vector<8x64xf32> to vector<8x16xf32>
    %78 = vector.extract_strided_slice %74 {offsets = [0, 16], sizes = [8, 16], strides = [1, 1]} : vector<8x64xf32> to vector<8x16xf32>
    %79 = vector.extract_strided_slice %74 {offsets = [0, 48], sizes = [8, 16], strides = [1, 1]} : vector<8x64xf32> to vector<8x16xf32>
    %80 = arith.mulf %78, %63 : vector<8x16xf32>
    %81 = arith.mulf %77, %76 : vector<8x16xf32>
    %82 = arith.addf %80, %81 : vector<8x16xf32>
    %83 = math.tanh %82 : vector<8x16xf32>
    %84 = arith.mulf %79, %83 : vector<8x16xf32>
    %c24 = arith.constant 24 : index
    %c0_22 = arith.constant 0 : index
    %85 = vector.load %arg17[%c24, %c0_22] : memref<64x16xf32, #tpu.memory_space<vmem>>, vector<8x16xf32>
    tpu.vector_store %arg17[%c24, %c0_22], %84 {strides = array<i32>} : memref<64x16xf32, #tpu.memory_space<vmem>>, vector<8x16xf32>,
    %86 = vector.extract_strided_slice %7 {offsets = [32, 0], sizes = [8, 64], strides = [1, 1]} : vector<64x64xf32> to vector<8x64xf32>
    %cst_23 = arith.constant dense<0.000000e+00> : vector<8x64xf32>
    %87 = tpu.matmul %84, %0, %cst_23 {dimension_numbers = #tpu.dot_dimension_numbers<[1], [0], [0], [1], [0, 0, 1, 1], [], []>} : vector<8x16xf32>, vector<16x64xf32>, vector<8x64xf32> -> vector<8x64xf32>
    %88 = arith.addf %86, %87 : vector<8x64xf32>
    %89 = arith.negf %88 : vector<8x64xf32>
    %90 = math.exp %89 : vector<8x64xf32>
    %cst_24 = arith.constant 1.000000e+00 : f32
    %91 = vector.broadcast %cst_24 : f32 to vector<8x64xf32>
    %92 = arith.addf %91, %90 : vector<8x64xf32>
    %93 = arith.divf %91, %92 : vector<8x64xf32>
    %94 = vector.extract_strided_slice %88 {offsets = [0, 32], sizes = [8, 16], strides = [1, 1]} : vector<8x64xf32> to vector<8x16xf32>
    %95 = math.tanh %94 : vector<8x16xf32>
    %96 = vector.extract_strided_slice %93 {offsets = [0, 0], sizes = [8, 16], strides = [1, 1]} : vector<8x64xf32> to vector<8x16xf32>
    %97 = vector.extract_strided_slice %93 {offsets = [0, 16], sizes = [8, 16], strides = [1, 1]} : vector<8x64xf32> to vector<8x16xf32>
    %98 = vector.extract_strided_slice %93 {offsets = [0, 48], sizes = [8, 16], strides = [1, 1]} : vector<8x64xf32> to vector<8x16xf32>
    %99 = arith.mulf %97, %82 : vector<8x16xf32>
    %100 = arith.mulf %96, %95 : vector<8x16xf32>
    %101 = arith.addf %99, %100 : vector<8x16xf32>
    %102 = math.tanh %101 : vector<8x16xf32>
    %103 = arith.mulf %98, %102 : vector<8x16xf32>
    %c32 = arith.constant 32 : index
    %c0_25 = arith.constant 0 : index
    %104 = vector.load %arg17[%c32, %c0_25] : memref<64x16xf32, #tpu.memory_space<vmem>>, vector<8x16xf32>
    tpu.vector_store %arg17[%c32, %c0_25], %103 {strides = array<i32>} : memref<64x16xf32, #tpu.memory_space<vmem>>, vector<8x16xf32>,
    %105 = vector.extract_strided_slice %7 {offsets = [40, 0], sizes = [8, 64], strides = [1, 1]} : vector<64x64xf32> to vector<8x64xf32>
    %cst_26 = arith.constant dense<0.000000e+00> : vector<8x64xf32>
    %106 = tpu.matmul %103, %0, %cst_26 {dimension_numbers = #tpu.dot_dimension_numbers<[1], [0], [0], [1], [0, 0, 1, 1], [], []>} : vector<8x16xf32>, vector<16x64xf32>, vector<8x64xf32> -> vector<8x64xf32>
    %107 = arith.addf %105, %106 : vector<8x64xf32>
    %108 = arith.negf %107 : vector<8x64xf32>
    %109 = math.exp %108 : vector<8x64xf32>
    %cst_27 = arith.constant 1.000000e+00 : f32
    %110 = vector.broadcast %cst_27 : f32 to vector<8x64xf32>
    %111 = arith.addf %110, %109 : vector<8x64xf32>
    %112 = arith.divf %110, %111 : vector<8x64xf32>
    %113 = vector.extract_strided_slice %107 {offsets = [0, 32], sizes = [8, 16], strides = [1, 1]} : vector<8x64xf32> to vector<8x16xf32>
    %114 = math.tanh %113 : vector<8x16xf32>
    %115 = vector.extract_strided_slice %112 {offsets = [0, 0], sizes = [8, 16], strides = [1, 1]} : vector<8x64xf32> to vector<8x16xf32>
    %116 = vector.extract_strided_slice %112 {offsets = [0, 16], sizes = [8, 16], strides = [1, 1]} : vector<8x64xf32> to vector<8x16xf32>
    %117 = vector.extract_strided_slice %112 {offsets = [0, 48], sizes = [8, 16], strides = [1, 1]} : vector<8x64xf32> to vector<8x16xf32>
    %118 = arith.mulf %116, %101 : vector<8x16xf32>
    %119 = arith.mulf %115, %114 : vector<8x16xf32>
    %120 = arith.addf %118, %119 : vector<8x16xf32>
    %121 = math.tanh %120 : vector<8x16xf32>
    %122 = arith.mulf %117, %121 : vector<8x16xf32>
    %c40 = arith.constant 40 : index
    %c0_28 = arith.constant 0 : index
    %123 = vector.load %arg17[%c40, %c0_28] : memref<64x16xf32, #tpu.memory_space<vmem>>, vector<8x16xf32>
    tpu.vector_store %arg17[%c40, %c0_28], %122 {strides = array<i32>} : memref<64x16xf32, #tpu.memory_space<vmem>>, vector<8x16xf32>,
    %124 = vector.extract_strided_slice %7 {offsets = [48, 0], sizes = [8, 64], strides = [1, 1]} : vector<64x64xf32> to vector<8x64xf32>
    %cst_29 = arith.constant dense<0.000000e+00> : vector<8x64xf32>
    %125 = tpu.matmul %122, %0, %cst_29 {dimension_numbers = #tpu.dot_dimension_numbers<[1], [0], [0], [1], [0, 0, 1, 1], [], []>} : vector<8x16xf32>, vector<16x64xf32>, vector<8x64xf32> -> vector<8x64xf32>
    %126 = arith.addf %124, %125 : vector<8x64xf32>
    %127 = arith.negf %126 : vector<8x64xf32>
    %128 = math.exp %127 : vector<8x64xf32>
    %cst_30 = arith.constant 1.000000e+00 : f32
    %129 = vector.broadcast %cst_30 : f32 to vector<8x64xf32>
    %130 = arith.addf %129, %128 : vector<8x64xf32>
    %131 = arith.divf %129, %130 : vector<8x64xf32>
    %132 = vector.extract_strided_slice %126 {offsets = [0, 32], sizes = [8, 16], strides = [1, 1]} : vector<8x64xf32> to vector<8x16xf32>
    %133 = math.tanh %132 : vector<8x16xf32>
    %134 = vector.extract_strided_slice %131 {offsets = [0, 0], sizes = [8, 16], strides = [1, 1]} : vector<8x64xf32> to vector<8x16xf32>
    %135 = vector.extract_strided_slice %131 {offsets = [0, 16], sizes = [8, 16], strides = [1, 1]} : vector<8x64xf32> to vector<8x16xf32>
    %136 = vector.extract_strided_slice %131 {offsets = [0, 48], sizes = [8, 16], strides = [1, 1]} : vector<8x64xf32> to vector<8x16xf32>
    %137 = arith.mulf %135, %120 : vector<8x16xf32>
    %138 = arith.mulf %134, %133 : vector<8x16xf32>
    %139 = arith.addf %137, %138 : vector<8x16xf32>
    %140 = math.tanh %139 : vector<8x16xf32>
    %141 = arith.mulf %136, %140 : vector<8x16xf32>
    %c48 = arith.constant 48 : index
    %c0_31 = arith.constant 0 : index
    %142 = vector.load %arg17[%c48, %c0_31] : memref<64x16xf32, #tpu.memory_space<vmem>>, vector<8x16xf32>
    tpu.vector_store %arg17[%c48, %c0_31], %141 {strides = array<i32>} : memref<64x16xf32, #tpu.memory_space<vmem>>, vector<8x16xf32>,
    %143 = vector.extract_strided_slice %7 {offsets = [56, 0], sizes = [8, 64], strides = [1, 1]} : vector<64x64xf32> to vector<8x64xf32>
    %cst_32 = arith.constant dense<0.000000e+00> : vector<8x64xf32>
    %144 = tpu.matmul %141, %0, %cst_32 {dimension_numbers = #tpu.dot_dimension_numbers<[1], [0], [0], [1], [0, 0, 1, 1], [], []>} : vector<8x16xf32>, vector<16x64xf32>, vector<8x64xf32> -> vector<8x64xf32>
    %145 = arith.addf %143, %144 : vector<8x64xf32>
    %146 = arith.negf %145 : vector<8x64xf32>
    %147 = math.exp %146 : vector<8x64xf32>
    %cst_33 = arith.constant 1.000000e+00 : f32
    %148 = vector.broadcast %cst_33 : f32 to vector<8x64xf32>
    %149 = arith.addf %148, %147 : vector<8x64xf32>
    %150 = arith.divf %148, %149 : vector<8x64xf32>
    %151 = vector.extract_strided_slice %145 {offsets = [0, 32], sizes = [8, 16], strides = [1, 1]} : vector<8x64xf32> to vector<8x16xf32>
    %152 = math.tanh %151 : vector<8x16xf32>
    %153 = vector.extract_strided_slice %150 {offsets = [0, 0], sizes = [8, 16], strides = [1, 1]} : vector<8x64xf32> to vector<8x16xf32>
    %154 = vector.extract_strided_slice %150 {offsets = [0, 16], sizes = [8, 16], strides = [1, 1]} : vector<8x64xf32> to vector<8x16xf32>
    %155 = vector.extract_strided_slice %150 {offsets = [0, 48], sizes = [8, 16], strides = [1, 1]} : vector<8x64xf32> to vector<8x16xf32>
    %156 = arith.mulf %154, %139 : vector<8x16xf32>
    %157 = arith.mulf %153, %152 : vector<8x16xf32>
    %158 = arith.addf %156, %157 : vector<8x16xf32>
    %159 = math.tanh %158 : vector<8x16xf32>
    %160 = arith.mulf %155, %159 : vector<8x16xf32>
    %c56 = arith.constant 56 : index
    %c0_34 = arith.constant 0 : index
    %161 = vector.load %arg17[%c56, %c0_34] : memref<64x16xf32, #tpu.memory_space<vmem>>, vector<8x16xf32>
    tpu.vector_store %arg17[%c56, %c0_34], %160 {strides = array<i32>} : memref<64x16xf32, #tpu.memory_space<vmem>>, vector<8x16xf32>,
    %c0_35 = arith.constant 0 : index
    %c0_36 = arith.constant 0 : index
    %162 = vector.load %arg5[%c0_35, %c0_36] : memref<16x64xf32, #tpu.memory_space<vmem>>, vector<16x64xf32>
    %c0_37 = arith.constant 0 : index
    %c0_38 = arith.constant 0 : index
    %163 = vector.load %arg6[%c0_37, %c0_38] : memref<1x64xf32, #tpu.memory_space<vmem>>, vector<1x64xf32>
    %c0_39 = arith.constant 0 : index
    %c0_40 = arith.constant 0 : index
    %164 = vector.load %arg17[%c0_39, %c0_40] : memref<64x16xf32, #tpu.memory_space<vmem>>, vector<64x16xf32>
    %c0_41 = arith.constant 0 : index
    %c0_42 = arith.constant 0 : index
    %165 = vector.load %arg4[%c0_41, %c0_42] : memref<16x64xf32, #tpu.memory_space<vmem>>, vector<16x64xf32>
    %cst_43 = arith.constant dense<0.000000e+00> : vector<64x64xf32>
    %166 = tpu.matmul %164, %165, %cst_43 {dimension_numbers = #tpu.dot_dimension_numbers<[1], [0], [0], [1], [0, 0, 1, 1], [], []>} : vector<64x16xf32>, vector<16x64xf32>, vector<64x64xf32> -> vector<64x64xf32>
    %167 = vector.broadcast %163 : vector<1x64xf32> to vector<64x64xf32>
    %168 = arith.addf %166, %167 : vector<64x64xf32>
    %cst_44 = arith.constant 0.000000e+00 : f32
    %169 = vector.broadcast %cst_44 : f32 to vector<8x16xf32>
    %cst_45 = arith.constant 0.000000e+00 : f32
    %170 = vector.broadcast %cst_45 : f32 to vector<8x16xf32>
    %171 = vector.extract_strided_slice %168 {offsets = [0, 0], sizes = [8, 64], strides = [1, 1]} : vector<64x64xf32> to vector<8x64xf32>
    %cst_46 = arith.constant dense<0.000000e+00> : vector<8x64xf32>
    %172 = tpu.matmul %169, %162, %cst_46 {dimension_numbers = #tpu.dot_dimension_numbers<[1], [0], [0], [1], [0, 0, 1, 1], [], []>} : vector<8x16xf32>, vector<16x64xf32>, vector<8x64xf32> -> vector<8x64xf32>
    %173 = arith.addf %171, %172 : vector<8x64xf32>
    %174 = arith.negf %173 : vector<8x64xf32>
    %175 = math.exp %174 : vector<8x64xf32>
    %cst_47 = arith.constant 1.000000e+00 : f32
    %176 = vector.broadcast %cst_47 : f32 to vector<8x64xf32>
    %177 = arith.addf %176, %175 : vector<8x64xf32>
    %178 = arith.divf %176, %177 : vector<8x64xf32>
    %179 = vector.extract_strided_slice %173 {offsets = [0, 32], sizes = [8, 16], strides = [1, 1]} : vector<8x64xf32> to vector<8x16xf32>
    %180 = math.tanh %179 : vector<8x16xf32>
    %181 = vector.extract_strided_slice %178 {offsets = [0, 0], sizes = [8, 16], strides = [1, 1]} : vector<8x64xf32> to vector<8x16xf32>
    %182 = vector.extract_strided_slice %178 {offsets = [0, 16], sizes = [8, 16], strides = [1, 1]} : vector<8x64xf32> to vector<8x16xf32>
    %183 = vector.extract_strided_slice %178 {offsets = [0, 48], sizes = [8, 16], strides = [1, 1]} : vector<8x64xf32> to vector<8x16xf32>
    %184 = arith.mulf %182, %170 : vector<8x16xf32>
    %185 = arith.mulf %181, %180 : vector<8x16xf32>
    %186 = arith.addf %184, %185 : vector<8x16xf32>
    %187 = math.tanh %186 : vector<8x16xf32>
    %188 = arith.mulf %183, %187 : vector<8x16xf32>
    %189 = vector.extract_strided_slice %168 {offsets = [8, 0], sizes = [8, 64], strides = [1, 1]} : vector<64x64xf32> to vector<8x64xf32>
    %cst_48 = arith.constant dense<0.000000e+00> : vector<8x64xf32>
    %190 = tpu.matmul %188, %162, %cst_48 {dimension_numbers = #tpu.dot_dimension_numbers<[1], [0], [0], [1], [0, 0, 1, 1], [], []>} : vector<8x16xf32>, vector<16x64xf32>, vector<8x64xf32> -> vector<8x64xf32>
    %191 = arith.addf %189, %190 : vector<8x64xf32>
    %192 = arith.negf %191 : vector<8x64xf32>
    %193 = math.exp %192 : vector<8x64xf32>
    %cst_49 = arith.constant 1.000000e+00 : f32
    %194 = vector.broadcast %cst_49 : f32 to vector<8x64xf32>
    %195 = arith.addf %194, %193 : vector<8x64xf32>
    %196 = arith.divf %194, %195 : vector<8x64xf32>
    %197 = vector.extract_strided_slice %191 {offsets = [0, 32], sizes = [8, 16], strides = [1, 1]} : vector<8x64xf32> to vector<8x16xf32>
    %198 = math.tanh %197 : vector<8x16xf32>
    %199 = vector.extract_strided_slice %196 {offsets = [0, 0], sizes = [8, 16], strides = [1, 1]} : vector<8x64xf32> to vector<8x16xf32>
    %200 = vector.extract_strided_slice %196 {offsets = [0, 16], sizes = [8, 16], strides = [1, 1]} : vector<8x64xf32> to vector<8x16xf32>
    %201 = vector.extract_strided_slice %196 {offsets = [0, 48], sizes = [8, 16], strides = [1, 1]} : vector<8x64xf32> to vector<8x16xf32>
    %202 = arith.mulf %200, %186 : vector<8x16xf32>
    %203 = arith.mulf %199, %198 : vector<8x16xf32>
    %204 = arith.addf %202, %203 : vector<8x16xf32>
    %205 = math.tanh %204 : vector<8x16xf32>
    %206 = arith.mulf %201, %205 : vector<8x16xf32>
    %207 = vector.extract_strided_slice %168 {offsets = [16, 0], sizes = [8, 64], strides = [1, 1]} : vector<64x64xf32> to vector<8x64xf32>
    %cst_50 = arith.constant dense<0.000000e+00> : vector<8x64xf32>
    %208 = tpu.matmul %206, %162, %cst_50 {dimension_numbers = #tpu.dot_dimension_numbers<[1], [0], [0], [1], [0, 0, 1, 1], [], []>} : vector<8x16xf32>, vector<16x64xf32>, vector<8x64xf32> -> vector<8x64xf32>
    %209 = arith.addf %207, %208 : vector<8x64xf32>
    %210 = arith.negf %209 : vector<8x64xf32>
    %211 = math.exp %210 : vector<8x64xf32>
    %cst_51 = arith.constant 1.000000e+00 : f32
    %212 = vector.broadcast %cst_51 : f32 to vector<8x64xf32>
    %213 = arith.addf %212, %211 : vector<8x64xf32>
    %214 = arith.divf %212, %213 : vector<8x64xf32>
    %215 = vector.extract_strided_slice %209 {offsets = [0, 32], sizes = [8, 16], strides = [1, 1]} : vector<8x64xf32> to vector<8x16xf32>
    %216 = math.tanh %215 : vector<8x16xf32>
    %217 = vector.extract_strided_slice %214 {offsets = [0, 0], sizes = [8, 16], strides = [1, 1]} : vector<8x64xf32> to vector<8x16xf32>
    %218 = vector.extract_strided_slice %214 {offsets = [0, 16], sizes = [8, 16], strides = [1, 1]} : vector<8x64xf32> to vector<8x16xf32>
    %219 = vector.extract_strided_slice %214 {offsets = [0, 48], sizes = [8, 16], strides = [1, 1]} : vector<8x64xf32> to vector<8x16xf32>
    %220 = arith.mulf %218, %204 : vector<8x16xf32>
    %221 = arith.mulf %217, %216 : vector<8x16xf32>
    %222 = arith.addf %220, %221 : vector<8x16xf32>
    %223 = math.tanh %222 : vector<8x16xf32>
    %224 = arith.mulf %219, %223 : vector<8x16xf32>
    %225 = vector.extract_strided_slice %168 {offsets = [24, 0], sizes = [8, 64], strides = [1, 1]} : vector<64x64xf32> to vector<8x64xf32>
    %cst_52 = arith.constant dense<0.000000e+00> : vector<8x64xf32>
    %226 = tpu.matmul %224, %162, %cst_52 {dimension_numbers = #tpu.dot_dimension_numbers<[1], [0], [0], [1], [0, 0, 1, 1], [], []>} : vector<8x16xf32>, vector<16x64xf32>, vector<8x64xf32> -> vector<8x64xf32>
    %227 = arith.addf %225, %226 : vector<8x64xf32>
    %228 = arith.negf %227 : vector<8x64xf32>
    %229 = math.exp %228 : vector<8x64xf32>
    %cst_53 = arith.constant 1.000000e+00 : f32
    %230 = vector.broadcast %cst_53 : f32 to vector<8x64xf32>
    %231 = arith.addf %230, %229 : vector<8x64xf32>
    %232 = arith.divf %230, %231 : vector<8x64xf32>
    %233 = vector.extract_strided_slice %227 {offsets = [0, 32], sizes = [8, 16], strides = [1, 1]} : vector<8x64xf32> to vector<8x16xf32>
    %234 = math.tanh %233 : vector<8x16xf32>
    %235 = vector.extract_strided_slice %232 {offsets = [0, 0], sizes = [8, 16], strides = [1, 1]} : vector<8x64xf32> to vector<8x16xf32>
    %236 = vector.extract_strided_slice %232 {offsets = [0, 16], sizes = [8, 16], strides = [1, 1]} : vector<8x64xf32> to vector<8x16xf32>
    %237 = vector.extract_strided_slice %232 {offsets = [0, 48], sizes = [8, 16], strides = [1, 1]} : vector<8x64xf32> to vector<8x16xf32>
    %238 = arith.mulf %236, %222 : vector<8x16xf32>
    %239 = arith.mulf %235, %234 : vector<8x16xf32>
    %240 = arith.addf %238, %239 : vector<8x16xf32>
    %241 = math.tanh %240 : vector<8x16xf32>
    %242 = arith.mulf %237, %241 : vector<8x16xf32>
    %243 = vector.extract_strided_slice %168 {offsets = [32, 0], sizes = [8, 64], strides = [1, 1]} : vector<64x64xf32> to vector<8x64xf32>
    %cst_54 = arith.constant dense<0.000000e+00> : vector<8x64xf32>
    %244 = tpu.matmul %242, %162, %cst_54 {dimension_numbers = #tpu.dot_dimension_numbers<[1], [0], [0], [1], [0, 0, 1, 1], [], []>} : vector<8x16xf32>, vector<16x64xf32>, vector<8x64xf32> -> vector<8x64xf32>
    %245 = arith.addf %243, %244 : vector<8x64xf32>
    %246 = arith.negf %245 : vector<8x64xf32>
    %247 = math.exp %246 : vector<8x64xf32>
    %cst_55 = arith.constant 1.000000e+00 : f32
    %248 = vector.broadcast %cst_55 : f32 to vector<8x64xf32>
    %249 = arith.addf %248, %247 : vector<8x64xf32>
    %250 = arith.divf %248, %249 : vector<8x64xf32>
    %251 = vector.extract_strided_slice %245 {offsets = [0, 32], sizes = [8, 16], strides = [1, 1]} : vector<8x64xf32> to vector<8x16xf32>
    %252 = math.tanh %251 : vector<8x16xf32>
    %253 = vector.extract_strided_slice %250 {offsets = [0, 0], sizes = [8, 16], strides = [1, 1]} : vector<8x64xf32> to vector<8x16xf32>
    %254 = vector.extract_strided_slice %250 {offsets = [0, 16], sizes = [8, 16], strides = [1, 1]} : vector<8x64xf32> to vector<8x16xf32>
    %255 = vector.extract_strided_slice %250 {offsets = [0, 48], sizes = [8, 16], strides = [1, 1]} : vector<8x64xf32> to vector<8x16xf32>
    %256 = arith.mulf %254, %240 : vector<8x16xf32>
    %257 = arith.mulf %253, %252 : vector<8x16xf32>
    %258 = arith.addf %256, %257 : vector<8x16xf32>
    %259 = math.tanh %258 : vector<8x16xf32>
    %260 = arith.mulf %255, %259 : vector<8x16xf32>
    %261 = vector.extract_strided_slice %168 {offsets = [40, 0], sizes = [8, 64], strides = [1, 1]} : vector<64x64xf32> to vector<8x64xf32>
    %cst_56 = arith.constant dense<0.000000e+00> : vector<8x64xf32>
    %262 = tpu.matmul %260, %162, %cst_56 {dimension_numbers = #tpu.dot_dimension_numbers<[1], [0], [0], [1], [0, 0, 1, 1], [], []>} : vector<8x16xf32>, vector<16x64xf32>, vector<8x64xf32> -> vector<8x64xf32>
    %263 = arith.addf %261, %262 : vector<8x64xf32>
    %264 = arith.negf %263 : vector<8x64xf32>
    %265 = math.exp %264 : vector<8x64xf32>
    %cst_57 = arith.constant 1.000000e+00 : f32
    %266 = vector.broadcast %cst_57 : f32 to vector<8x64xf32>
    %267 = arith.addf %266, %265 : vector<8x64xf32>
    %268 = arith.divf %266, %267 : vector<8x64xf32>
    %269 = vector.extract_strided_slice %263 {offsets = [0, 32], sizes = [8, 16], strides = [1, 1]} : vector<8x64xf32> to vector<8x16xf32>
    %270 = math.tanh %269 : vector<8x16xf32>
    %271 = vector.extract_strided_slice %268 {offsets = [0, 0], sizes = [8, 16], strides = [1, 1]} : vector<8x64xf32> to vector<8x16xf32>
    %272 = vector.extract_strided_slice %268 {offsets = [0, 16], sizes = [8, 16], strides = [1, 1]} : vector<8x64xf32> to vector<8x16xf32>
    %273 = vector.extract_strided_slice %268 {offsets = [0, 48], sizes = [8, 16], strides = [1, 1]} : vector<8x64xf32> to vector<8x16xf32>
    %274 = arith.mulf %272, %258 : vector<8x16xf32>
    %275 = arith.mulf %271, %270 : vector<8x16xf32>
    %276 = arith.addf %274, %275 : vector<8x16xf32>
    %277 = math.tanh %276 : vector<8x16xf32>
    %278 = arith.mulf %273, %277 : vector<8x16xf32>
    %279 = vector.extract_strided_slice %168 {offsets = [48, 0], sizes = [8, 64], strides = [1, 1]} : vector<64x64xf32> to vector<8x64xf32>
    %cst_58 = arith.constant dense<0.000000e+00> : vector<8x64xf32>
    %280 = tpu.matmul %278, %162, %cst_58 {dimension_numbers = #tpu.dot_dimension_numbers<[1], [0], [0], [1], [0, 0, 1, 1], [], []>} : vector<8x16xf32>, vector<16x64xf32>, vector<8x64xf32> -> vector<8x64xf32>
    %281 = arith.addf %279, %280 : vector<8x64xf32>
    %282 = arith.negf %281 : vector<8x64xf32>
    %283 = math.exp %282 : vector<8x64xf32>
    %cst_59 = arith.constant 1.000000e+00 : f32
    %284 = vector.broadcast %cst_59 : f32 to vector<8x64xf32>
    %285 = arith.addf %284, %283 : vector<8x64xf32>
    %286 = arith.divf %284, %285 : vector<8x64xf32>
    %287 = vector.extract_strided_slice %281 {offsets = [0, 32], sizes = [8, 16], strides = [1, 1]} : vector<8x64xf32> to vector<8x16xf32>
    %288 = math.tanh %287 : vector<8x16xf32>
    %289 = vector.extract_strided_slice %286 {offsets = [0, 0], sizes = [8, 16], strides = [1, 1]} : vector<8x64xf32> to vector<8x16xf32>
    %290 = vector.extract_strided_slice %286 {offsets = [0, 16], sizes = [8, 16], strides = [1, 1]} : vector<8x64xf32> to vector<8x16xf32>
    %291 = vector.extract_strided_slice %286 {offsets = [0, 48], sizes = [8, 16], strides = [1, 1]} : vector<8x64xf32> to vector<8x16xf32>
    %292 = arith.mulf %290, %276 : vector<8x16xf32>
    %293 = arith.mulf %289, %288 : vector<8x16xf32>
    %294 = arith.addf %292, %293 : vector<8x16xf32>
    %295 = math.tanh %294 : vector<8x16xf32>
    %296 = arith.mulf %291, %295 : vector<8x16xf32>
    %297 = vector.extract_strided_slice %168 {offsets = [56, 0], sizes = [8, 64], strides = [1, 1]} : vector<64x64xf32> to vector<8x64xf32>
    %cst_60 = arith.constant dense<0.000000e+00> : vector<8x64xf32>
    %298 = tpu.matmul %296, %162, %cst_60 {dimension_numbers = #tpu.dot_dimension_numbers<[1], [0], [0], [1], [0, 0, 1, 1], [], []>} : vector<8x16xf32>, vector<16x64xf32>, vector<8x64xf32> -> vector<8x64xf32>
    %299 = arith.addf %297, %298 : vector<8x64xf32>
    %300 = arith.negf %299 : vector<8x64xf32>
    %301 = math.exp %300 : vector<8x64xf32>
    %cst_61 = arith.constant 1.000000e+00 : f32
    %302 = vector.broadcast %cst_61 : f32 to vector<8x64xf32>
    %303 = arith.addf %302, %301 : vector<8x64xf32>
    %304 = arith.divf %302, %303 : vector<8x64xf32>
    %305 = vector.extract_strided_slice %299 {offsets = [0, 32], sizes = [8, 16], strides = [1, 1]} : vector<8x64xf32> to vector<8x16xf32>
    %306 = math.tanh %305 : vector<8x16xf32>
    %307 = vector.extract_strided_slice %304 {offsets = [0, 0], sizes = [8, 16], strides = [1, 1]} : vector<8x64xf32> to vector<8x16xf32>
    %308 = vector.extract_strided_slice %304 {offsets = [0, 16], sizes = [8, 16], strides = [1, 1]} : vector<8x64xf32> to vector<8x16xf32>
    %309 = vector.extract_strided_slice %304 {offsets = [0, 48], sizes = [8, 16], strides = [1, 1]} : vector<8x64xf32> to vector<8x16xf32>
    %310 = arith.mulf %308, %294 : vector<8x16xf32>
    %311 = arith.mulf %307, %306 : vector<8x16xf32>
    %312 = arith.addf %310, %311 : vector<8x16xf32>
    %313 = math.tanh %312 : vector<8x16xf32>
    %314 = arith.mulf %309, %313 : vector<8x16xf32>
    %315 = tpu.concatenate %160, %314 in 1 : vector<8x16xf32>, vector<8x16xf32> -> vector<8x32xf32>
    %c0_62 = arith.constant 0 : index
    %c0_63 = arith.constant 0 : index
    %316 = vector.load %arg7[%c0_62, %c0_63] : memref<32x64xf32, #tpu.memory_space<vmem>>, vector<32x64xf32>
    %cst_64 = arith.constant dense<0.000000e+00> : vector<8x64xf32>
    %317 = tpu.matmul %315, %316, %cst_64 {dimension_numbers = #tpu.dot_dimension_numbers<[1], [0], [0], [1], [0, 0, 1, 1], [], []>} : vector<8x32xf32>, vector<32x64xf32>, vector<8x64xf32> -> vector<8x64xf32>
    %c0_65 = arith.constant 0 : index
    %c0_66 = arith.constant 0 : index
    %318 = vector.load %arg8[%c0_65, %c0_66] : memref<1x64xf32, #tpu.memory_space<vmem>>, vector<1x64xf32>
    %319 = vector.broadcast %318 : vector<1x64xf32> to vector<8x64xf32>
    %320 = arith.addf %317, %319 : vector<8x64xf32>
    %cst_67 = arith.constant 0.000000e+00 : f32
    %321 = vector.broadcast %cst_67 : f32 to vector<8x64xf32>
    %322 = arith.maximumf %320, %321 : vector<8x64xf32>
    %c0_68 = arith.constant 0 : index
    %c0_69 = arith.constant 0 : index
    %323 = vector.load %arg9[%c0_68, %c0_69] : memref<64x64xf32, #tpu.memory_space<vmem>>, vector<64x64xf32>
    %cst_70 = arith.constant dense<0.000000e+00> : vector<8x64xf32>
    %324 = tpu.matmul %322, %323, %cst_70 {dimension_numbers = #tpu.dot_dimension_numbers<[1], [0], [0], [1], [0, 0, 1, 1], [], []>} : vector<8x64xf32>, vector<64x64xf32>, vector<8x64xf32> -> vector<8x64xf32>
    %c0_71 = arith.constant 0 : index
    %c0_72 = arith.constant 0 : index
    %325 = vector.load %arg10[%c0_71, %c0_72] : memref<1x64xf32, #tpu.memory_space<vmem>>, vector<1x64xf32>
    %326 = vector.broadcast %325 : vector<1x64xf32> to vector<8x64xf32>
    %327 = arith.addf %324, %326 : vector<8x64xf32>
    %cst_73 = arith.constant 0.000000e+00 : f32
    %328 = vector.broadcast %cst_73 : f32 to vector<8x64xf32>
    %329 = arith.maximumf %327, %328 : vector<8x64xf32>
    %c0_74 = arith.constant 0 : index
    %c0_75 = arith.constant 0 : index
    %330 = vector.load %arg11[%c0_74, %c0_75] : memref<64x64xf32, #tpu.memory_space<vmem>>, vector<64x64xf32>
    %cst_76 = arith.constant dense<0.000000e+00> : vector<8x64xf32>
    %331 = tpu.matmul %329, %330, %cst_76 {dimension_numbers = #tpu.dot_dimension_numbers<[1], [0], [0], [1], [0, 0, 1, 1], [], []>} : vector<8x64xf32>, vector<64x64xf32>, vector<8x64xf32> -> vector<8x64xf32>
    %c0_77 = arith.constant 0 : index
    %c0_78 = arith.constant 0 : index
    %332 = vector.load %arg12[%c0_77, %c0_78] : memref<1x64xf32, #tpu.memory_space<vmem>>, vector<1x64xf32>
    %333 = vector.broadcast %332 : vector<1x64xf32> to vector<8x64xf32>
    %334 = arith.addf %331, %333 : vector<8x64xf32>
    %cst_79 = arith.constant 0.000000e+00 : f32
    %335 = vector.broadcast %cst_79 : f32 to vector<8x64xf32>
    %336 = arith.maximumf %334, %335 : vector<8x64xf32>
    %c0_80 = arith.constant 0 : index
    %c0_81 = arith.constant 0 : index
    %337 = vector.load %arg13[%c0_80, %c0_81] : memref<64x8xf32, #tpu.memory_space<vmem>>, vector<64x8xf32>
    %cst_82 = arith.constant dense<0.000000e+00> : vector<8x8xf32>
    %338 = tpu.matmul %336, %337, %cst_82 {dimension_numbers = #tpu.dot_dimension_numbers<[1], [0], [0], [1], [0, 0, 1, 1], [], []>} : vector<8x64xf32>, vector<64x8xf32>, vector<8x8xf32> -> vector<8x8xf32>
    %c0_83 = arith.constant 0 : index
    %c0_84 = arith.constant 0 : index
    %339 = vector.load %arg14[%c0_83, %c0_84] : memref<1x8xf32, #tpu.memory_space<vmem>>, vector<1x8xf32>
    %340 = vector.broadcast %339 : vector<1x8xf32> to vector<8x8xf32>
    %341 = arith.addf %338, %340 : vector<8x8xf32>
    %342 = vector.extract_strided_slice %341 {offsets = [0, 0], sizes = [8, 4], strides = [1, 1]} : vector<8x8xf32> to vector<8x4xf32>
    %343 = vector.extract_strided_slice %341 {offsets = [0, 4], sizes = [8, 4], strides = [1, 1]} : vector<8x8xf32> to vector<8x4xf32>
    %cst_85 = arith.constant -2.000000e+01 : f32
    %cst_86 = arith.constant 2.000000e+00 : f32
    %344 = vector.broadcast %cst_85 : f32 to vector<8x4xf32>
    %345 = arith.maximumf %344, %343 : vector<8x4xf32>
    %346 = vector.broadcast %cst_86 : f32 to vector<8x4xf32>
    %347 = arith.minimumf %346, %345 : vector<8x4xf32>
    %348 = math.exp %347 : vector<8x4xf32>
    %c0_87 = arith.constant 0 : index
    %c0_88 = arith.constant 0 : index
    %349 = vector.load %arg15[%c0_87, %c0_88] : memref<8x4xf32, #tpu.memory_space<vmem>>, vector<8x4xf32>
    %350 = arith.mulf %348, %349 : vector<8x4xf32>
    %351 = arith.addf %342, %350 : vector<8x4xf32>
    %352 = math.tanh %351 : vector<8x4xf32>
    %353 = vector.extract_strided_slice %351 {offsets = [0, 0], sizes = [1, 4], strides = [1, 1]} : vector<8x4xf32> to vector<1x4xf32>
    %354 = vector.broadcast %353 : vector<1x4xf32> to vector<8x4xf32>
    %355 = arith.subf %354, %342 : vector<8x4xf32>
    %cst_89 = arith.constant 0.000000e+00 : f32
    %356 = vector.broadcast %cst_89 : f32 to vector<8x4xf32>
    %357 = arith.subf %356, %347 : vector<8x4xf32>
    %358 = math.exp %357 : vector<8x4xf32>
    %359 = arith.mulf %355, %358 : vector<8x4xf32>
    %cst_90 = arith.constant -5.000000e-01 : f32
    %360 = vector.broadcast %cst_90 : f32 to vector<8x4xf32>
    %361 = arith.mulf %360, %359 : vector<8x4xf32>
    %362 = arith.mulf %361, %359 : vector<8x4xf32>
    %363 = arith.subf %362, %347 : vector<8x4xf32>
    %cst_91 = arith.constant 0.918938517 : f32
    %364 = vector.broadcast %cst_91 : f32 to vector<8x4xf32>
    %365 = arith.subf %363, %364 : vector<8x4xf32>
    %cst_92 = arith.constant 0.693147182 : f32
    %366 = vector.broadcast %cst_92 : f32 to vector<1x4xf32>
    %367 = arith.subf %366, %353 : vector<1x4xf32>
    %cst_93 = arith.constant -2.000000e+00 : f32
    %368 = vector.broadcast %cst_93 : f32 to vector<1x4xf32>
    %369 = arith.mulf %368, %353 : vector<1x4xf32>
    %cst_94 = arith.constant 0.000000e+00 : f32
    %370 = vector.broadcast %cst_94 : f32 to vector<1x4xf32>
    %371 = arith.maximumf %369, %370 : vector<1x4xf32>
    %372 = vector.broadcast %cst_94 : f32 to vector<1x4xf32>
    %373 = arith.subf %369, %372 : vector<1x4xf32>
    %374 = arith.cmpf one, %373, %373 : vector<1x4xf32>
    %375 = vector.broadcast %cst_94 : f32 to vector<1x4xf32>
    %376 = arith.addf %369, %375 : vector<1x4xf32>
    %377 = math.absf %373 : vector<1x4xf32>
    %cst_95 = arith.constant 0.000000e+00 : f32
    %378 = vector.broadcast %cst_95 : f32 to vector<1x4xf32>
    %379 = arith.subf %378, %377 : vector<1x4xf32>
    %380 = math.exp %379 : vector<1x4xf32>
    %381 = math.log1p %380 : vector<1x4xf32>
    %382 = arith.addf %371, %381 : vector<1x4xf32>
    %383 = arith.select %374, %376, %382 : vector<1x4xi1>, vector<1x4xf32>
    %384 = arith.subf %367, %383 : vector<1x4xf32>
    %cst_96 = arith.constant 2.000000e+00 : f32
    %385 = vector.broadcast %cst_96 : f32 to vector<1x4xf32>
    %386 = arith.mulf %385, %384 : vector<1x4xf32>
    %387 = vector.broadcast %386 : vector<1x4xf32> to vector<8x4xf32>
    %388 = arith.subf %365, %387 : vector<8x4xf32>
    %389 = tpu.concatenate %342, %348, %352, %388 in 1 : vector<8x4xf32>, vector<8x4xf32>, vector<8x4xf32>, vector<8x4xf32> -> vector<8x16xf32>
    %c0_97 = arith.constant 0 : index
    %c0_98 = arith.constant 0 : index
    %390 = vector.load %arg16[%c0_97, %c0_98] : memref<8x16xf32, #tpu.memory_space<vmem>>, vector<8x16xf32>
    tpu.vector_store %arg16[%c0_97, %c0_98], %389 {strides = array<i32>} : memref<8x16xf32, #tpu.memory_space<vmem>>, vector<8x16xf32>,
    return
  }
}

</mosaic_0001>

<bundles_post_ra>
// kernel: tpu_custom_call.1
= control target key start
LH: loop header
LB: loop body
LE: loop exit
PB: predicated region body
PF: predicated region fallthrough
CT: control target
= control target key end

     0   :  { %s2371_s0 = inlined_call_operand.vmem [shape: f32[8,8,8], index: 0, kind: input, shape index: {}]   ;;  %s2372_s1 = inlined_call_operand.vmem [shape: f32[8,64], index: 1, kind: input, shape index: {}]   ;;  %s2373_s2 = inlined_call_operand.hbm [shape: f32[16,64], index: 2, kind: input, shape index: {}]   ;;  %s2374_s3 = inlined_call_operand.vmem [shape: f32[1,64], index: 3, kind: input, shape index: {}]   ;;  %s2375_s4 = inlined_call_operand.hbm [shape: f32[16,64], index: 4, kind: input, shape index: {}]   ;;  %s2376_s5 = inlined_call_operand.hbm [shape: f32[16,64], index: 5, kind: input, shape index: {}]   ;;  %s2377_s6 = inlined_call_operand.vmem [shape: f32[1,64], index: 6, kind: input, shape index: {}]   ;;  %s2378_s7 = inlined_call_operand.hbm [shape: f32[32,64], index: 7, kind: input, shape index: {}]   ;;  %s2379_s8 = inlined_call_operand.vmem [shape: f32[1,64], index: 8, kind: input, shape index: {}]   ;;  %s2380_s9 = inlined_call_operand.hbm [shape: f32[64,64], index: 9, kind: input, shape index: {}]   ;;  %s2381_s10 = inlined_call_operand.vmem [shape: f32[1,64], index: 10, kind: input, shape index: {}]   ;;  %s2382_s11 = inlined_call_operand.hbm [shape: f32[64,64], index: 11, kind: input, shape index: {}]   ;;  %s2383_s12 = inlined_call_operand.vmem [shape: f32[1,64], index: 12, kind: input, shape index: {}]   ;;  %s2384_s13 = inlined_call_operand.vmem [shape: f32[64,8], index: 13, kind: input, shape index: {}]   ;;  %s2385_s14 = inlined_call_operand.vmem [shape: f32[1,8], index: 14, kind: input, shape index: {}]   ;;  %s2386_s15 = inlined_call_operand.vmem [shape: f32[8,4], index: 15, kind: input, shape index: {}]   ;;  %s2387_s16 = inlined_call_operand.hbm [shape: f32[8,16], index: 16, kind: output, shape index: {}]  }
   0x1   :  { %2389 = sst [smem:[#allocation20_spill]] %s2371_s0 }
   0x2   :  { %21 = vsyncpa [#allocation4], 0 }
   0x3   :  { %22 = vsyncpa [#allocation7], 0 }
   0x4   :  { %23 = vsyncpa [#allocation10], 0 }
   0x5   :  { %24 = vsyncpa [#allocation13], 0 }
   0x6   :  { %25 = vsyncpa [#allocation5], 0  ;;  %s49_s23 = sshll.u32 %s2375_s4, 4  ;;  %s1960_s24 = smov [#allocation6]   ;;  %s50_s23 = int_to_ptr.hbm [resolvable:$true] %s49_s23 }
   0x7   :  { %s51_s25 = sshll.u32 %s1960_s24, 4  ;;  %s77_s28 = sshll.u32 %s2378_s7, 4  ;;  %s52_s25 = int_to_ptr.vmem [resolvable:$true] %s51_s25  ;;  %s78_s28 = int_to_ptr.hbm [resolvable:$true] %s77_s28 }
   0x8   :  { %s1961_s29 = smov 128   ;;  %s1962_s30 = smov 8  }
   0x9   :  { %57 = dma.hbm_to_vmem [thread:$0]  %s50_s23, 256, %s52_s25, [#allocation7], %s1961_s29, %s1961_s29, %s1962_s30  }
   0xa   :  { %s1963_s0 = smov [#allocation9]   ;;  %s34_s4 = sshll.u32 %s2373_s2, 4  ;;  %s35_s4 = int_to_ptr.hbm [resolvable:$true] %s34_s4 }
   0xb   :  { %s79_s17 = sshll.u32 %s1963_s0, 4  ;;  %s62_s21 = sshll.u32 %s2376_s5, 4  ;;  %s80_s17 = int_to_ptr.vmem [resolvable:$true] %s79_s17  ;;  %s63_s21 = int_to_ptr.hbm [resolvable:$true] %s62_s21 }
   0xc   :  { %85 = dma.hbm_to_vmem [thread:$0]  %s78_s28, 512, %s80_s17, [#allocation10], %s1961_s29, %s1961_s29, %s1962_s30  }
   0xd   :  { %s1964_s22 = smov [#allocation3]   ;;  %s1965_s23 = smov [#allocation8]  }
   0xe   :  { %s36_s24 = sshll.u32 %s1964_s22, 4  ;;  %s64_s2 = sshll.u32 %s1965_s23, 4  ;;  %s37_s24 = int_to_ptr.vmem [resolvable:$true] %s36_s24  ;;  %s65_s2 = int_to_ptr.vmem [resolvable:$true] %s64_s2 }
   0xf   :  { %42 = dma.hbm_to_vmem [thread:$0]  %s35_s4, 256, %s37_s24, [#allocation4], %s1961_s29, %s1961_s29, %s1962_s30  }
  0x10   :  { %s92_s27 = sshll.u32 %s2380_s9, 4  ;;  %s107_s0 = sshll.u32 %s2382_s11, 4  ;;  %s93_s27 = int_to_ptr.hbm [resolvable:$true] %s92_s27  ;;  %s108_s0 = int_to_ptr.hbm [resolvable:$true] %s107_s0 }
  0x11   :  { %70 = dma.hbm_to_vmem [thread:$0]  %s63_s21, 256, %s65_s2, [#allocation7], %s1961_s29, %s1961_s29, %s1962_s30  }
  0x12   :  { %s1966_s17 = smov [#allocation11]   ;;  %s1967_s19 = smov [#allocation12]  }
  0x13   :  { %s94_s18 = sshll.u32 %s1966_s17, 4  ;;  %s109_s9 = sshll.u32 %s1967_s19, 4  ;;  %s95_s18 = int_to_ptr.vmem [resolvable:$true] %s94_s18  ;;  %s110_s9 = int_to_ptr.vmem [resolvable:$true] %s109_s9 }
  0x14   :  { %100 = dma.hbm_to_vmem [thread:$0]  %s93_s27, 1024, %s95_s18, [#allocation10], %s1961_s29, %s1961_s29, %s1962_s30  }
  0x15   :  { %115 = dma.hbm_to_vmem [thread:$0]  %s108_s0, 1024, %s110_s9, [#allocation13], %s1961_s29, %s1961_s29, %s1962_s30  }
  0x16   :  { %1950 = dma.done.wait [#allocation4], 256  }
  0x17   :  { %1951 = vsyncadd [#allocation4], 4294967040 }
  0x18   :  { %1952 = dma.done.wait [#allocation7], 512  }
  0x19   :  { %1953 = vsyncadd [#allocation7], 4294966784 }
  0x1a   :  { %1954 = dma.done.wait [#allocation10], 1536  }
  0x1b   :  { %1955 = vsyncadd [#allocation10], 4294965760 }
  0x1c   :  { %1956 = dma.done.wait [#allocation13], 1024  }
  0x1d   :  { %1957 = vsyncadd [#allocation13], 4294966272  ;;  %vm163_vm0 = vcmask 64512   ;;  %v159_v0 = vld [vmem:[%s2372_s1] sm:$0xff]  ;;  %v2101_v1 = vld [vmem:[#allocation3 + $0x8] sm:$0xff]  ;;  %s2390_s21 = sld [smem:[#allocation20_spill]] }
  0x1e   :  { %203 = vmatpush.msra.mxu0 %v159_v0  ;;  %247 = vmatpush.msra.mxu1 %v2101_v1  ;;  %v2107_v3 = vld [vmem:[#allocation3] sm:$0xff]  ;;  %v1968_v4 = vmov 0.0   ;;  %s1969_s22 = smov 96   ;;  %s1970_s24 = smov 16   ;;  %vm229_vm5 = vcmask 130048  }
  0x1f   :  { %312 = vmatpush.msra.mxu2 %v2101_v1  ;;  %377 = vmatpush.msra.mxu3 %v2101_v1  ;;  %v2127_v5 = vld [vmem:[%s2374_s3] ss:$0 sm:$0xff]  ;;  %s1971_s23 = smov 32   ;;  %s1972_s2 = smov 80  }
  0x20   :  { %248 = vmatpush.msra.mxu1 %v2107_v3  ;;  %s1973_s1 = smov 4  }
  0x21   :  { %249 = vmatmul.f32.vlgmr.msra.gmra.mxu1 %v1968_v4  ;;  %313 = vmatpush.msra.mxu2 %v2107_v3 }
  0x22   :  { %378 = vmatpush.msra.mxu3 %v2107_v3  ;;  %442 = vmatpush.msrb.mxu1 %v2101_v1 }
  0x23   :  { %v151_v2 = vld [vmem:[%s2390_s21] sm:$0xff]  ;;  %507 = vmatpush.msrb.mxu2 %v2101_v1  ;;  %v152_v32 = vld [vmem:[%s2390_s21 + $0x8] sm:$0xff]  ;;  %v153_v60 = vld [vmem:[%s2390_s21 + $0x10] sm:$0xff] }
  0x24   :  { %1569 = vmatmul.msk.f32.vlgmr.msra.gmra.mxu0 %vm163_vm0, %v151_v2  ;;  %572 = vmatpush.msrb.mxu3 %v2101_v1 }
  0x25   :  { %443 = vmatpush.msrb.mxu1 %v2107_v3  ;;  %508 = vmatpush.msrb.mxu2 %v2107_v3 }
  0x26   :  { %573 = vmatpush.msrb.mxu3 %v2107_v3 }
  0x27   :  { %637 = vmatpush.msra.mxu1 %v2101_v1 }
  0x29   :  { %638 = vmatpush.msra.mxu1 %v2107_v3 }
  0x2c   :  { %1570 = vmatmul.msk.f32.gmra.mxu0 %vm163_vm0, %v152_v32 }
  0x34   :  { %1571 = vmatmul.msk.f32.gmra.mxu0 %vm163_vm0, %v153_v60 }
  0x9e   :  { %v250_v8 = vpop.f32.mrf.mxu1 }
  0xa1   :  { %v205_v6 = vpop.f32.mrf.mxu0 }
  0xa2   :  { %v206_v7 = vadd.f32 %v2127_v5, %v205_v6 }
  0xa4   :  { %v253_v9 = vadd.f32 %v250_v8, %v206_v7 }
  0xa6   :  { %1643 = vtanh.f32 %v253_v9  ;;  %v1577_v11 = vmul.f32 -1.442695, %v253_v9 }
  0xa8   :  { %1645 = vpow2.f32 %v1577_v11 }
  0xa9   :  { %v208_v34 = vpop.f32.mrf.mxu0 }
  0xaa   :  { %v209_v35 = vadd.f32 %v2127_v5, %v208_v34 }
  0xac   :  { %v1644_v10 = vpop.eup %1643 }
  0xad   :  { %276 = vrot.lane.b32.xlu0 %v1644_v10, %s1969_s22 }
  0xae   :  { %v1646_v12 = vpop.eup %1645 }
  0xaf   :  { %v257_v13 = vadd.f32 1.0, %v1646_v12 }
  0xb1   :  { %1647 = vrcp.f32 %v257_v13  ;;  %v269_v19 = vand.u32 2147483648, %v257_v13  ;;  %vm263_vm2 = vweird.f32 %v257_v13  ;;  %v267_v20 = vand.u32 2147483647, %v257_v13  ;;  %v211_v62 = vpop.f32.mrf.mxu0 }
  0xb2   :  { %v212_v63 = vadd.f32 %v2127_v5, %v211_v62 }
  0xb3   :  { %v270_v22 = vor.u32 1.1754944e-38, %v269_v19  ;;  %vm268_vm4 = vcmp.eq.f32.partialorder %v267_v20, 8.507059e+37 }
  0xb7   :  { %v1648_v14 = vpop.eup %1647 }
  0xb8   :  { %v259_v15 = vmul.f32 %v1648_v14, %v257_v13  ;;  %vm264_vm1 = vweird.f32 %v1648_v14 }
  0xb9   :  { %vm265_vm3 = vmor %vm263_vm2, %vm264_vm1 }
  0xba   :  { %v260_v16 = vsub.f32 1.0, %v259_v15 }
  0xbc   :  { %v261_v17 = vmul.f32 %v1648_v14, %v260_v16 }
  0xbe   :  { %v262_v18 = vadd.f32 %v1648_v14, %v261_v17 }
  0xc0   :  { %v266_v21 = vsel %vm265_vm3, %v1648_v14, %v262_v18 }
  0xc1   :  { %v271_v24 = vsel %vm268_vm4, %v270_v22, %v266_v21 }
  0xc2   :  { %v274_v26 = vmul.f32 0.0, %v271_v24 }
 0x11f   :  { %v277_v23 = vpop.permute.xlu0 %276 }
 0x120   :  { %v279_v25 = vmul.f32 %v277_v23, %v271_v24 }
 0x122   :  { %281 = vrot.lane.b32.xlu0 %v279_v25, %s1970_s24 }
 0x194   :  { %v282_v27 = vpop.permute.xlu0 %281 }
 0x195   :  { %v284_v28 = vadd.f32 %v282_v27, %v274_v26 }
 0x197   :  { %1649 = vtanh.f32 %v284_v28 }
 0x19d   :  { %v1650_v29 = vpop.eup %1649 }
 0x19e   :  { %287 = vrot.lane.b32.xlu1 %v1650_v29, %s1971_s23 }
 0x210   :  { %v288_v30 = vpop.permute.xlu1 %287 }
 0x211   :  { %v290_v31 = vmul.f32 %v288_v30, %v271_v24  ;;  %v154_v24 = vld [vmem:[%s2390_s21 + $0x18] sm:$0xff] }
 0x212   :  { %1572 = vmatmul.msk.f32.gmra.mxu0 %vm163_vm0, %v154_v24 }
 0x213   :  { %292 = vrot.lane.b32.xlu1 %v290_v31, %s1972_s2 }
 0x285   :  { %v293_v33 = vpop.permute.xlu1 %292 }
 0x286   :  { %295 = vst.msk [vmem:[#allocation2] sm:$0xff] %vm229_vm5, %v293_v33  ;;  %1578 = vmatmul.msk.f32.vlgmr.msra.gmra.mxu2 %vm229_vm5, %v293_v33 }
 0x287   :  { %702 = vmatpush.msra.mxu2 %v2101_v1 }
 0x289   :  { %703 = vmatpush.msra.mxu2 %v2107_v3 }
 0x28d   :  { %v754_v24 = vld [vmem:[#allocation2] sm:$0xff] }
 0x309   :  { %v315_v36 = vpop.f32.mrf.mxu2 }
 0x30a   :  { %v318_v37 = vadd.f32 %v315_v36, %v209_v35 }
 0x30c   :  { %1651 = vtanh.f32 %v318_v37  ;;  %v1579_v39 = vmul.f32 -1.442695, %v318_v37 }
 0x30e   :  { %1653 = vpow2.f32 %v1579_v39 }
 0x312   :  { %v1652_v38 = vpop.eup %1651 }
 0x313   :  { %341 = vrot.lane.b32.xlu2 %v1652_v38, %s1969_s22 }
 0x314   :  { %v1654_v40 = vpop.eup %1653 }
 0x315   :  { %v322_v41 = vadd.f32 1.0, %v1654_v40 }
 0x317   :  { %1655 = vrcp.f32 %v322_v41  ;;  %v334_v47 = vand.u32 2147483648, %v322_v41  ;;  %vm328_vm7 = vweird.f32 %v322_v41  ;;  %v332_v48 = vand.u32 2147483647, %v322_v41 }
 0x319   :  { %v335_v50 = vor.u32 1.1754944e-38, %v334_v47  ;;  %vm333_vm9 = vcmp.eq.f32.partialorder %v332_v48, 8.507059e+37 }
 0x31d   :  { %v1656_v42 = vpop.eup %1655 }
 0x31e   :  { %v324_v43 = vmul.f32 %v1656_v42, %v322_v41  ;;  %vm329_vm6 = vweird.f32 %v1656_v42 }
 0x31f   :  { %vm330_vm8 = vmor %vm328_vm7, %vm329_vm6 }
 0x320   :  { %v325_v44 = vsub.f32 1.0, %v324_v43 }
 0x322   :  { %v326_v45 = vmul.f32 %v1656_v42, %v325_v44 }
 0x324   :  { %v327_v46 = vadd.f32 %v1656_v42, %v326_v45 }
 0x326   :  { %v331_v49 = vsel %vm330_vm8, %v1656_v42, %v327_v46 }
 0x327   :  { %v336_v52 = vsel %vm333_vm9, %v335_v50, %v331_v49 }
 0x328   :  { %v339_v54 = vmul.f32 %v336_v52, %v284_v28  ;;  %v214_v28 = vpop.f32.mrf.mxu0 }
 0x329   :  { %v215_v29 = vadd.f32 %v2127_v5, %v214_v28 }
 0x36d   :  { %v342_v51 = vpop.permute.xlu2 %341 }
 0x36e   :  { %v344_v53 = vmul.f32 %v342_v51, %v336_v52 }
 0x370   :  { %346 = vrot.lane.b32.xlu2 %v344_v53, %s1970_s24 }
 0x3ca   :  { %v347_v55 = vpop.permute.xlu2 %346 }
 0x3cb   :  { %v349_v56 = vadd.f32 %v347_v55, %v339_v54  ;;  %v155_v54 = vld [vmem:[%s2390_s21 + $0x20] sm:$0xff] }
 0x3cc   :  { %1573 = vmatmul.msk.f32.gmra.mxu0 %vm163_vm0, %v155_v54 }
 0x3cd   :  { %1657 = vtanh.f32 %v349_v56 }
 0x3d3   :  { %v1658_v57 = vpop.eup %1657 }
 0x3d4   :  { %352 = vrot.lane.b32.xlu0 %v1658_v57, %s1971_s23 }
 0x446   :  { %v353_v58 = vpop.permute.xlu0 %352 }
 0x447   :  { %v355_v59 = vmul.f32 %v353_v58, %v336_v52 }
 0x449   :  { %357 = vrot.lane.b32.xlu1 %v355_v59, %s1972_s2 }
 0x4bb   :  { %v358_v61 = vpop.permute.xlu1 %357 }
 0x4bc   :  { %360 = vst.msk [vmem:[#allocation2 + $0x8] sm:$0xff] %vm229_vm5, %v358_v61  ;;  %1580 = vmatmul.msk.f32.vlgmr.msra.gmra.mxu3 %vm229_vm5, %v358_v61 }
 0x53f   :  { %v380_v0 = vpop.f32.mrf.mxu3 }
 0x540   :  { %v383_v1 = vadd.f32 %v380_v0, %v212_v63 }
 0x542   :  { %1659 = vtanh.f32 %v383_v1  ;;  %v1581_v3 = vmul.f32 -1.442695, %v383_v1 }
 0x544   :  { %1661 = vpow2.f32 %v1581_v3 }
 0x548   :  { %v1660_v2 = vpop.eup %1659 }
 0x549   :  { %406 = vrot.lane.b32.xlu2 %v1660_v2, %s1969_s22 }
 0x54a   :  { %v1662_v6 = vpop.eup %1661 }
 0x54b   :  { %v387_v7 = vadd.f32 1.0, %v1662_v6 }
 0x54d   :  { %1663 = vrcp.f32 %v387_v7  ;;  %v399_v13 = vand.u32 2147483648, %v387_v7  ;;  %vm393_vm11 = vweird.f32 %v387_v7  ;;  %v397_v14 = vand.u32 2147483647, %v387_v7 }
 0x54f   :  { %v400_v16 = vor.u32 1.1754944e-38, %v399_v13  ;;  %vm398_vm13 = vcmp.eq.f32.partialorder %v397_v14, 8.507059e+37 }
 0x553   :  { %v1664_v8 = vpop.eup %1663 }
 0x554   :  { %v389_v9 = vmul.f32 %v1664_v8, %v387_v7  ;;  %vm394_vm10 = vweird.f32 %v1664_v8 }
 0x555   :  { %vm395_vm12 = vmor %vm393_vm11, %vm394_vm10 }
 0x556   :  { %v390_v10 = vsub.f32 1.0, %v389_v9 }
 0x558   :  { %v391_v11 = vmul.f32 %v1664_v8, %v390_v10 }
 0x55a   :  { %v392_v12 = vadd.f32 %v1664_v8, %v391_v11 }
 0x55c   :  { %v396_v15 = vsel %vm395_vm12, %v1664_v8, %v392_v12 }
 0x55d   :  { %v401_v18 = vsel %vm398_vm13, %v400_v16, %v396_v15 }
 0x55e   :  { %v404_v20 = vmul.f32 %v401_v18, %v349_v56  ;;  %v217_v56 = vpop.f32.mrf.mxu0 }
 0x55f   :  { %v218_v57 = vadd.f32 %v2127_v5, %v217_v56  ;;  %v2203_v56 = vld [vmem:[#allocation8 + $0x8] sm:$0xff] }
 0x5a3   :  { %v407_v17 = vpop.permute.xlu2 %406 }
 0x5a4   :  { %v409_v19 = vmul.f32 %v407_v17, %v401_v18 }
 0x5a6   :  { %411 = vrot.lane.b32.xlu0 %v409_v19, %s1970_s24 }
 0x618   :  { %v412_v21 = vpop.permute.xlu0 %411 }
 0x619   :  { %v414_v22 = vadd.f32 %v412_v21, %v404_v20  ;;  %v156_v20 = vld [vmem:[%s2390_s21 + $0x28] sm:$0xff]  ;;  %v763_v21 = vld [vmem:[#allocation6 + $0x8] sm:$0xff] }
 0x61a   :  { %1574 = vmatmul.msk.f32.gmra.mxu0 %vm163_vm0, %v156_v20  ;;  %805 = vmatpush.msra.mxu3 %v763_v21 }
 0x61b   :  { %1665 = vtanh.f32 %v414_v22 }
 0x621   :  { %v1666_v23 = vpop.eup %1665 }
 0x622   :  { %417 = vrot.lane.b32.xlu1 %v1666_v23, %s1971_s23 }
 0x694   :  { %v418_v25 = vpop.permute.xlu1 %417 }
 0x695   :  { %v420_v26 = vmul.f32 %v418_v25, %v401_v18  ;;  %v755_v25 = vld [vmem:[#allocation2 + $0x8] sm:$0xff] }
 0x697   :  { %422 = vrot.lane.b32.xlu2 %v420_v26, %s1972_s2 }
 0x6f1   :  { %v423_v27 = vpop.permute.xlu2 %422 }
 0x6f2   :  { %425 = vst.msk [vmem:[#allocation2 + $0x10] sm:$0xff] %vm229_vm5, %v423_v27  ;;  %1582 = vmatmul.msk.f32.vlgmr.msrb.gmra.mxu1 %vm229_vm5, %v423_v27 }
 0x6f3   :  { %846 = vmatpush.msrb.mxu1 %v2203_v56 }
 0x6f9   :  { %v756_v26 = vld [vmem:[#allocation2 + $0x10] sm:$0xff] }
 0x76f   :  { %v445_v30 = vpop.f32.mrf.mxu1 }
 0x770   :  { %v448_v31 = vadd.f32 %v445_v30, %v215_v29  ;;  %v220_v29 = vpop.f32.mrf.mxu0 }
 0x771   :  { %v221_v30 = vadd.f32 %v2127_v5, %v220_v29 }
 0x772   :  { %1667 = vtanh.f32 %v448_v31  ;;  %v1583_v33 = vmul.f32 -1.442695, %v448_v31 }
 0x774   :  { %1669 = vpow2.f32 %v1583_v33 }
 0x778   :  { %v1668_v32 = vpop.eup %1667 }
 0x779   :  { %471 = vrot.lane.b32.xlu0 %v1668_v32, %s1969_s22 }
 0x77a   :  { %v1670_v34 = vpop.eup %1669 }
 0x77b   :  { %v452_v35 = vadd.f32 1.0, %v1670_v34 }
 0x77d   :  { %1671 = vrcp.f32 %v452_v35  ;;  %v464_v41 = vand.u32 2147483648, %v452_v35  ;;  %vm458_vm15 = vweird.f32 %v452_v35  ;;  %v462_v42 = vand.u32 2147483647, %v452_v35 }
 0x77f   :  { %v465_v44 = vor.u32 1.1754944e-38, %v464_v41  ;;  %vm463_vm2 = vcmp.eq.f32.partialorder %v462_v42, 8.507059e+37 }
 0x783   :  { %v1672_v36 = vpop.eup %1671 }
 0x784   :  { %v454_v37 = vmul.f32 %v1672_v36, %v452_v35  ;;  %vm459_vm14 = vweird.f32 %v1672_v36 }
 0x785   :  { %vm460_vm1 = vmor %vm458_vm15, %vm459_vm14 }
 0x786   :  { %v455_v38 = vsub.f32 1.0, %v454_v37 }
 0x788   :  { %v456_v39 = vmul.f32 %v1672_v36, %v455_v38 }
 0x78a   :  { %v457_v40 = vadd.f32 %v1672_v36, %v456_v39 }
 0x78c   :  { %v461_v43 = vsel %vm460_vm1, %v1672_v36, %v457_v40 }
 0x78d   :  { %v466_v46 = vsel %vm463_vm2, %v465_v44, %v461_v43 }
 0x78e   :  { %v469_v48 = vmul.f32 %v466_v46, %v414_v22  ;;  %v762_v22 = vld [vmem:[#allocation6] sm:$0xff] }
 0x78f   :  { %806 = vmatpush.msra.mxu3 %v762_v22 }
 0x7eb   :  { %v472_v45 = vpop.permute.xlu0 %471 }
 0x7ec   :  { %v474_v47 = vmul.f32 %v472_v45, %v466_v46 }
 0x7ee   :  { %476 = vrot.lane.b32.xlu1 %v474_v47, %s1970_s24 }
 0x860   :  { %v477_v49 = vpop.permute.xlu1 %476 }
 0x861   :  { %v479_v50 = vadd.f32 %v477_v49, %v469_v48 }
 0x863   :  { %1673 = vtanh.f32 %v479_v50 }
 0x869   :  { %v1674_v51 = vpop.eup %1673 }
 0x86a   :  { %482 = vrot.lane.b32.xlu2 %v1674_v51, %s1971_s23 }
 0x8c4   :  { %v483_v52 = vpop.permute.xlu2 %482 }
 0x8c5   :  { %v485_v53 = vmul.f32 %v483_v52, %v466_v46 }
 0x8c7   :  { %487 = vrot.lane.b32.xlu0 %v485_v53, %s1972_s2  ;;  %v157_v53 = vld [vmem:[%s2390_s21 + $0x30] sm:$0xff] }
 0x8c8   :  { %1575 = vmatmul.msk.f32.gmra.mxu0 %vm163_vm0, %v157_v53 }
 0x939   :  { %v488_v55 = vpop.permute.xlu0 %487 }
 0x93a   :  { %490 = vst.msk [vmem:[#allocation2 + $0x18] sm:$0xff] %vm229_vm5, %v488_v55  ;;  %1584 = vmatmul.msk.f32.vlgmr.msrb.gmra.mxu2 %vm229_vm5, %v488_v55 }
 0x93b   :  { %909 = vmatpush.msrb.mxu2 %v2203_v56 }
 0x941   :  { %v757_v27 = vld [vmem:[#allocation2 + $0x18] sm:$0xff] }
 0x9bd   :  { %v510_v58 = vpop.f32.mrf.mxu2 }
 0x9be   :  { %v513_v59 = vadd.f32 %v510_v58, %v218_v57  ;;  %v2205_v57 = vld [vmem:[#allocation8] sm:$0xff] }
 0x9bf   :  { %847 = vmatpush.msrb.mxu1 %v2205_v57  ;;  %910 = vmatpush.msrb.mxu2 %v2205_v57 }
 0x9c0   :  { %1675 = vtanh.f32 %v513_v59  ;;  %v1585_v61 = vmul.f32 -1.442695, %v513_v59 }
 0x9c2   :  { %1677 = vpow2.f32 %v1585_v61 }
 0x9c6   :  { %v1676_v60 = vpop.eup %1675 }
 0x9c7   :  { %536 = vrot.lane.b32.xlu1 %v1676_v60, %s1969_s22  ;;  %v223_v60 = vpop.f32.mrf.mxu0 }
 0x9c8   :  { %v1678_v62 = vpop.eup %1677  ;;  %v224_v61 = vadd.f32 %v2127_v5, %v223_v60 }
 0x9c9   :  { %v517_v63 = vadd.f32 1.0, %v1678_v62 }
 0x9cb   :  { %1679 = vrcp.f32 %v517_v63  ;;  %v529_v7 = vand.u32 2147483648, %v517_v63  ;;  %vm523_vm4 = vweird.f32 %v517_v63  ;;  %v527_v8 = vand.u32 2147483647, %v517_v63 }
 0x9cd   :  { %v530_v10 = vor.u32 1.1754944e-38, %v529_v7  ;;  %vm528_vm7 = vcmp.eq.f32.partialorder %v527_v8, 8.507059e+37 }
 0x9d1   :  { %v1680_v0 = vpop.eup %1679 }
 0x9d2   :  { %v519_v1 = vmul.f32 %v1680_v0, %v517_v63  ;;  %vm524_vm3 = vweird.f32 %v1680_v0 }
 0x9d3   :  { %vm525_vm6 = vmor %vm523_vm4, %vm524_vm3 }
 0x9d4   :  { %v520_v2 = vsub.f32 1.0, %v519_v1 }
 0x9d6   :  { %v521_v3 = vmul.f32 %v1680_v0, %v520_v2 }
 0x9d8   :  { %v522_v6 = vadd.f32 %v1680_v0, %v521_v3 }
 0x9da   :  { %v526_v9 = vsel %vm525_vm6, %v1680_v0, %v522_v6  ;;  %v2223_v0 = vld [vmem:[%s2377_s6] ss:$0 sm:$0xff] }
 0x9db   :  { %v531_v12 = vsel %vm528_vm7, %v530_v10, %v526_v9 }
 0x9dc   :  { %v534_v14 = vmul.f32 %v531_v12, %v479_v50 }
 0xa39   :  { %v537_v11 = vpop.permute.xlu1 %536 }
 0xa3a   :  { %v539_v13 = vmul.f32 %v537_v11, %v531_v12 }
 0xa3c   :  { %541 = vrot.lane.b32.xlu2 %v539_v13, %s1970_s24 }
 0xa96   :  { %v542_v15 = vpop.permute.xlu2 %541 }
 0xa97   :  { %v544_v16 = vadd.f32 %v542_v15, %v534_v14 }
 0xa99   :  { %1681 = vtanh.f32 %v544_v16 }
 0xa9f   :  { %v1682_v17 = vpop.eup %1681 }
 0xaa0   :  { %547 = vrot.lane.b32.xlu0 %v1682_v17, %s1971_s23 }
 0xb12   :  { %v548_v18 = vpop.permute.xlu0 %547 }
 0xb13   :  { %v550_v19 = vmul.f32 %v548_v18, %v531_v12 }
 0xb15   :  { %552 = vrot.lane.b32.xlu1 %v550_v19, %s1972_s2 }
 0xb87   :  { %v553_v23 = vpop.permute.xlu1 %552 }
 0xb88   :  { %555 = vst.msk [vmem:[#allocation2 + $0x20] sm:$0xff] %vm229_vm5, %v553_v23  ;;  %1586 = vmatmul.msk.f32.vlgmr.msrb.gmra.mxu3 %vm229_vm5, %v553_v23 }
 0xb8f   :  { %v758_v28 = vld [vmem:[#allocation2 + $0x20] sm:$0xff] }
 0xb90   :  { %1592 = vmatmul.msk.f32.vlgmr.msra.gmra.mxu3 %vm229_vm5, %v754_v24 }
 0xb98   :  { %1593 = vmatmul.msk.f32.gmra.mxu3 %vm229_vm5, %v755_v25 }
 0xba0   :  { %1594 = vmatmul.msk.f32.gmra.mxu3 %vm229_vm5, %v756_v26 }
 0xba8   :  { %1595 = vmatmul.msk.f32.gmra.mxu3 %vm229_vm5, %v757_v27 }
 0xbb0   :  { %1596 = vmatmul.msk.f32.gmra.mxu3 %vm229_vm5, %v758_v28 }
 0xc0b   :  { %v575_v31 = vpop.f32.mrf.mxu3 }
 0xc0c   :  { %v578_v32 = vadd.f32 %v575_v31, %v221_v30 }
 0xc0e   :  { %1683 = vtanh.f32 %v578_v32  ;;  %v1587_v34 = vmul.f32 -1.442695, %v578_v32 }
 0xc10   :  { %1685 = vpow2.f32 %v1587_v34 }
 0xc13   :  { %v808_v1 = vpop.f32.mrf.mxu3 }
 0xc14   :  { %v1684_v33 = vpop.eup %1683  ;;  %v809_v2 = vadd.f32 %v2223_v0, %v808_v1 }
 0xc15   :  { %601 = vrot.lane.b32.xlu2 %v1684_v33, %s1969_s22 }
 0xc16   :  { %v1686_v35 = vpop.eup %1685 }
 0xc17   :  { %v582_v36 = vadd.f32 1.0, %v1686_v35 }
 0xc19   :  { %1687 = vrcp.f32 %v582_v36  ;;  %v594_v42 = vand.u32 2147483648, %v582_v36  ;;  %vm588_vm9 = vweird.f32 %v582_v36  ;;  %v592_v43 = vand.u32 2147483647, %v582_v36 }
 0xc1b   :  { %v595_v45 = vor.u32 1.1754944e-38, %v594_v42  ;;  %vm593_vm11 = vcmp.eq.f32.partialorder %v592_v43, 8.507059e+37 }
 0xc1f   :  { %v1688_v37 = vpop.eup %1687 }
 0xc20   :  { %v584_v38 = vmul.f32 %v1688_v37, %v582_v36  ;;  %vm589_vm8 = vweird.f32 %v1688_v37 }
 0xc21   :  { %vm590_vm10 = vmor %vm588_vm9, %vm589_vm8 }
 0xc22   :  { %v585_v39 = vsub.f32 1.0, %v584_v38 }
 0xc24   :  { %v586_v40 = vmul.f32 %v1688_v37, %v585_v39 }
 0xc26   :  { %v587_v41 = vadd.f32 %v1688_v37, %v586_v40 }
 0xc28   :  { %v591_v44 = vsel %vm590_vm10, %v1688_v37, %v587_v41 }
 0xc29   :  { %v596_v47 = vsel %vm593_vm11, %v595_v45, %v591_v44 }
 0xc2a   :  { %v599_v49 = vmul.f32 %v596_v47, %v544_v16 }
 0xc6f   :  { %v602_v46 = vpop.permute.xlu2 %601 }
 0xc70   :  { %v604_v48 = vmul.f32 %v602_v46, %v596_v47 }
 0xc72   :  { %606 = vrot.lane.b32.xlu0 %v604_v48, %s1970_s24 }
 0xce4   :  { %v607_v50 = vpop.permute.xlu0 %606 }
 0xce5   :  { %v2194_v51 = vadd.f32 %v607_v50, %v599_v49  ;;  %v158_v49 = vld [vmem:[%s2390_s21 + $0x38] sm:$0xff] }
 0xce6   :  { %1576 = vmatmul.msk.f32.gmra.mxu0 %vm163_vm0, %v158_v49 }
 0xce7   :  { %1689 = vtanh.f32 %v2194_v51 }
 0xced   :  { %v1690_v52 = vpop.eup %1689 }
 0xcee   :  { %612 = vrot.lane.b32.xlu1 %v1690_v52, %s1971_s23 }
 0xd60   :  { %v613_v54 = vpop.permute.xlu1 %612 }
 0xd61   :  { %v615_v55 = vmul.f32 %v613_v54, %v596_v47  ;;  %v811_v54 = vpop.f32.mrf.mxu3 }
 0xd63   :  { %617 = vrot.lane.b32.xlu2 %v615_v55, %s1972_s2  ;;  %v812_v55 = vadd.f32 %v2223_v0, %v811_v54 }
 0xdbd   :  { %v618_v58 = vpop.permute.xlu2 %617 }
 0xdbe   :  { %620 = vst.msk [vmem:[#allocation2 + $0x28] sm:$0xff] %vm229_vm5, %v618_v58  ;;  %1588 = vmatmul.msk.f32.vlgmr.msra.gmra.mxu1 %vm229_vm5, %v618_v58 }
 0xdbf   :  { %972 = vmatpush.msra.mxu1 %v2203_v56 }
 0xdc1   :  { %973 = vmatpush.msra.mxu1 %v2205_v57 }
 0xdc5   :  { %v759_v59 = vld [vmem:[#allocation2 + $0x28] sm:$0xff] }
 0xdc6   :  { %1597 = vmatmul.msk.f32.gmra.mxu3 %vm229_vm5, %v759_v59  ;;  %848 = vmatmul.f32.vlgmr.msrb.gmra.mxu1 %v1968_v4 }
 0xdc7   :  { %1098 = vmatpush.msrb.mxu1 %v2203_v56 }
 0xdc9   :  { %1099 = vmatpush.msrb.mxu1 %v2205_v57 }
 0xe3b   :  { %v640_v62 = vpop.f32.mrf.mxu1 }
 0xe3c   :  { %v643_v63 = vadd.f32 %v640_v62, %v224_v61 }
 0xe3e   :  { %1691 = vtanh.f32 %v643_v63  ;;  %v1589_v5 = vmul.f32 -1.442695, %v643_v63 }
 0xe43   :  { %v849_v3 = vpop.f32.mrf.mxu1 }
 0xe44   :  { %v1692_v4 = vpop.eup %1691  ;;  %v852_v6 = vadd.f32 %v849_v3, %v809_v2 }
 0xe45   :  { %666 = vrot.lane.b32.xlu0 %v1692_v4, %s1969_s22 }
 0xe46   :  { %1693 = vtanh.f32 %v852_v6  ;;  %v1600_v8 = vmul.f32 -1.442695, %v852_v6 }
 0xe47   :  { %1695 = vpow2.f32 %v1589_v5 }
 0xe48   :  { %1697 = vpow2.f32 %v1600_v8 }
 0xe4c   :  { %v1694_v7 = vpop.eup %1693 }
 0xe4d   :  { %875 = vrot.lane.b32.xlu1 %v1694_v7, %s1969_s22  ;;  %v1696_v9 = vpop.eup %1695 }
 0xe4e   :  { %v647_v10 = vadd.f32 1.0, %v1696_v9  ;;  %v1698_v11 = vpop.eup %1697 }
 0xe4f   :  { %v856_v12 = vadd.f32 1.0, %v1698_v11 }
 0xe50   :  { %1699 = vrcp.f32 %v647_v10  ;;  %v659_v21 = vand.u32 2147483648, %v647_v10  ;;  %vm653_vm13 = vweird.f32 %v647_v10  ;;  %v657_v22 = vand.u32 2147483647, %v647_v10 }
 0xe51   :  { %1701 = vrcp.f32 %v856_v12  ;;  %v868_v30 = vand.u32 2147483648, %v856_v12  ;;  %vm862_vm2 = vweird.f32 %v856_v12  ;;  %v866_v31 = vand.u32 2147483647, %v856_v12 }
 0xe52   :  { %v660_v25 = vor.u32 1.1754944e-38, %v659_v21  ;;  %vm658_vm15 = vcmp.eq.f32.partialorder %v657_v22, 8.507059e+37 }
 0xe53   :  { %v869_v33 = vor.u32 1.1754944e-38, %v868_v30  ;;  %vm867_vm4 = vcmp.eq.f32.partialorder %v866_v31, 8.507059e+37 }
 0xe56   :  { %v1700_v13 = vpop.eup %1699 }
 0xe57   :  { %v649_v14 = vmul.f32 %v1700_v13, %v647_v10  ;;  %v1702_v16 = vpop.eup %1701  ;;  %vm654_vm12 = vweird.f32 %v1700_v13 }
 0xe58   :  { %v858_v18 = vmul.f32 %v1702_v16, %v856_v12  ;;  %vm655_vm14 = vmor %vm653_vm13, %vm654_vm12  ;;  %vm863_vm1 = vweird.f32 %v1702_v16 }
 0xe59   :  { %v650_v15 = vsub.f32 1.0, %v649_v14  ;;  %vm864_vm3 = vmor %vm862_vm2, %vm863_vm1 }
 0xe5a   :  { %v859_v20 = vsub.f32 1.0, %v858_v18 }
 0xe5b   :  { %v651_v17 = vmul.f32 %v1700_v13, %v650_v15 }
 0xe5c   :  { %v860_v24 = vmul.f32 %v1702_v16, %v859_v20  ;;  %v814_v20 = vpop.f32.mrf.mxu3 }
 0xe5d   :  { %v652_v19 = vadd.f32 %v1700_v13, %v651_v17  ;;  %v815_v21 = vadd.f32 %v2223_v0, %v814_v20 }
 0xe5e   :  { %v861_v29 = vadd.f32 %v1702_v16, %v860_v24 }
 0xe5f   :  { %v656_v23 = vsel %vm655_vm14, %v1700_v13, %v652_v19 }
 0xe60   :  { %v661_v27 = vsel %vm658_vm15, %v660_v25, %v656_v23  ;;  %v865_v32 = vsel %vm864_vm3, %v1702_v16, %v861_v29 }
 0xe61   :  { %v870_v35 = vsel %vm867_vm4, %v869_v33, %v865_v32  ;;  %v664_v37 = vmul.f32 %v661_v27, %v2194_v51 }
 0xe62   :  { %v873_v41 = vmul.f32 0.0, %v870_v35 }
 0xeb7   :  { %v667_v26 = vpop.permute.xlu0 %666 }
 0xeb8   :  { %v669_v28 = vmul.f32 %v667_v26, %v661_v27 }
 0xeba   :  { %671 = vrot.lane.b32.xlu2 %v669_v28, %s1970_s24 }
 0xebf   :  { %v876_v34 = vpop.permute.xlu1 %875 }
 0xec0   :  { %v878_v36 = vmul.f32 %v876_v34, %v870_v35 }
 0xec2   :  { %880 = vrot.lane.b32.xlu0 %v878_v36, %s1970_s24 }
 0xf14   :  { %v672_v38 = vpop.permute.xlu2 %671 }
 0xf15   :  { %v2231_v39 = vadd.f32 %v672_v38, %v664_v37 }
 0xf17   :  { %1703 = vtanh.f32 %v2231_v39 }
 0xf1d   :  { %v1704_v40 = vpop.eup %1703 }
 0xf1e   :  { %677 = vrot.lane.b32.xlu1 %v1704_v40, %s1971_s23 }
 0xf34   :  { %v881_v42 = vpop.permute.xlu0 %880 }
 0xf35   :  { %v883_v43 = vadd.f32 %v881_v42, %v873_v41 }
 0xf37   :  { %1705 = vtanh.f32 %v883_v43 }
 0xf3d   :  { %v1706_v44 = vpop.eup %1705 }
 0xf3e   :  { %886 = vrot.lane.b32.xlu2 %v1706_v44, %s1971_s23 }
 0xf90   :  { %v678_v45 = vpop.permute.xlu1 %677 }
 0xf91   :  { %v680_v46 = vmul.f32 %v678_v45, %v661_v27 }
 0xf93   :  { %682 = vrot.lane.b32.xlu0 %v680_v46, %s1972_s2 }
 0xf98   :  { %v887_v47 = vpop.permute.xlu2 %886 }
 0xf99   :  { %v889_v48 = vmul.f32 %v887_v47, %v870_v35 }
 0xf9b   :  { %891 = vrot.lane.b32.xlu1 %v889_v48, %s1972_s2  ;;  %v817_v48 = vpop.f32.mrf.mxu3 }
 0xf9c   :  { %v818_v49 = vadd.f32 %v2223_v0, %v817_v48 }
0x1005   :  { %v683_v50 = vpop.permute.xlu0 %682 }
0x1006   :  { %685 = vst.msk [vmem:[#allocation2 + $0x30] sm:$0xff] %vm229_vm5, %v683_v50  ;;  %1590 = vmatmul.msk.f32.vlgmr.msra.gmra.mxu2 %vm229_vm5, %v683_v50 }
0x1007   :  { %1035 = vmatpush.msra.mxu2 %v2203_v56 }
0x1009   :  { %1036 = vmatpush.msra.mxu2 %v2205_v57 }
0x100d   :  { %v892_v51 = vpop.permute.xlu1 %891  ;;  %v760_v52 = vld [vmem:[#allocation2 + $0x30] sm:$0xff] }
0x100e   :  { %1598 = vmatmul.msk.f32.gmra.mxu3 %vm229_vm5, %v760_v52  ;;  %1601 = vmatmul.msk.f32.vlgmr.msrb.gmra.mxu2 %vm229_vm5, %v892_v51 }
0x100f   :  { %1161 = vmatpush.msrb.mxu2 %v2203_v56 }
0x1011   :  { %1162 = vmatpush.msrb.mxu2 %v2205_v57 }
0x1089   :  { %v2250_v53 = vpop.f32.mrf.mxu2 }
0x1091   :  { %v912_v58 = vpop.f32.mrf.mxu2 }
0x1092   :  { %v915_v59 = vadd.f32 %v912_v58, %v812_v55 }
0x1094   :  { %1707 = vtanh.f32 %v915_v59  ;;  %v1602_v61 = vmul.f32 -1.442695, %v915_v59 }
0x1096   :  { %1709 = vpow2.f32 %v1602_v61 }
0x109a   :  { %v1708_v60 = vpop.eup %1707 }
0x109b   :  { %938 = vrot.lane.b32.xlu2 %v1708_v60, %s1969_s22 }
0x109c   :  { %v1710_v62 = vpop.eup %1709 }
0x109d   :  { %v919_v63 = vadd.f32 1.0, %v1710_v62 }
0x109f   :  { %1711 = vrcp.f32 %v919_v63  ;;  %v931_v7 = vand.u32 2147483648, %v919_v63  ;;  %vm925_vm7 = vweird.f32 %v919_v63  ;;  %v929_v5 = vand.u32 2147483647, %v919_v63 }
0x10a1   :  { %v932_v9 = vor.u32 1.1754944e-38, %v931_v7  ;;  %vm930_vm9 = vcmp.eq.f32.partialorder %v929_v5, 8.507059e+37 }
0x10a5   :  { %v1712_v1 = vpop.eup %1711 }
0x10a6   :  { %v921_v2 = vmul.f32 %v1712_v1, %v919_v63  ;;  %vm926_vm6 = vweird.f32 %v1712_v1 }
0x10a7   :  { %vm927_vm8 = vmor %vm925_vm7, %vm926_vm6 }
0x10a8   :  { %v922_v3 = vsub.f32 1.0, %v921_v2 }
0x10aa   :  { %v923_v4 = vmul.f32 %v1712_v1, %v922_v3 }
0x10ac   :  { %v924_v6 = vadd.f32 %v1712_v1, %v923_v4 }
0x10ae   :  { %v928_v8 = vsel %vm927_vm8, %v1712_v1, %v924_v6 }
0x10af   :  { %v933_v11 = vsel %vm930_vm9, %v932_v9, %v928_v8 }
0x10b0   :  { %v936_v13 = vmul.f32 %v933_v11, %v883_v43 }
0x10f5   :  { %v939_v10 = vpop.permute.xlu2 %938 }
0x10f6   :  { %v941_v12 = vmul.f32 %v939_v10, %v933_v11 }
0x10f8   :  { %943 = vrot.lane.b32.xlu0 %v941_v12, %s1970_s24 }
0x116a   :  { %v944_v14 = vpop.permute.xlu0 %943 }
0x116b   :  { %v946_v15 = vadd.f32 %v944_v14, %v936_v13  ;;  %v820_v13 = vpop.f32.mrf.mxu3 }
0x116c   :  { %v821_v14 = vadd.f32 %v2223_v0, %v820_v13 }
0x116d   :  { %1713 = vtanh.f32 %v946_v15 }
0x1173   :  { %v1714_v16 = vpop.eup %1713 }
0x1174   :  { %949 = vrot.lane.b32.xlu1 %v1714_v16, %s1971_s23 }
0x11e6   :  { %v950_v17 = vpop.permute.xlu1 %949 }
0x11e7   :  { %v952_v18 = vmul.f32 %v950_v17, %v933_v11 }
0x11e9   :  { %954 = vrot.lane.b32.xlu2 %v952_v18, %s1972_s2 }
0x1243   :  { %v955_v19 = vpop.permute.xlu2 %954 }
0x1244   :  { %1603 = vmatmul.msk.f32.vlgmr.msra.gmra.mxu1 %vm229_vm5, %v955_v19 }
0x1245   :  { %1224 = vmatpush.msra.mxu1 %v2203_v56 }
0x1247   :  { %1225 = vmatpush.msra.mxu1 %v2205_v57 }
0x12c1   :  { %v975_v22 = vpop.f32.mrf.mxu1 }
0x12c2   :  { %v978_v23 = vadd.f32 %v975_v22, %v815_v21 }
0x12c4   :  { %1715 = vtanh.f32 %v978_v23  ;;  %v1604_v25 = vmul.f32 -1.442695, %v978_v23 }
0x12c6   :  { %1717 = vpow2.f32 %v1604_v25 }
0x12ca   :  { %v1716_v24 = vpop.eup %1715 }
0x12cb   :  { %1001 = vrot.lane.b32.xlu0 %v1716_v24, %s1969_s22 }
0x12cc   :  { %v1718_v26 = vpop.eup %1717 }
0x12cd   :  { %v982_v27 = vadd.f32 1.0, %v1718_v26 }
0x12cf   :  { %1719 = vrcp.f32 %v982_v27  ;;  %v994_v33 = vand.u32 2147483648, %v982_v27  ;;  %vm988_vm11 = vweird.f32 %v982_v27  ;;  %v992_v34 = vand.u32 2147483647, %v982_v27 }
0x12d1   :  { %v995_v36 = vor.u32 1.1754944e-38, %v994_v33  ;;  %vm993_vm13 = vcmp.eq.f32.partialorder %v992_v34, 8.507059e+37 }
0x12d5   :  { %v1720_v28 = vpop.eup %1719 }
0x12d6   :  { %v984_v29 = vmul.f32 %v1720_v28, %v982_v27  ;;  %vm989_vm10 = vweird.f32 %v1720_v28 }
0x12d7   :  { %vm990_vm12 = vmor %vm988_vm11, %vm989_vm10 }
0x12d8   :  { %v985_v30 = vsub.f32 1.0, %v984_v29 }
0x12da   :  { %v986_v31 = vmul.f32 %v1720_v28, %v985_v30 }
0x12dc   :  { %v987_v32 = vadd.f32 %v1720_v28, %v986_v31 }
0x12de   :  { %v991_v35 = vsel %vm990_vm12, %v1720_v28, %v987_v32 }
0x12df   :  { %v996_v38 = vsel %vm993_vm13, %v995_v36, %v991_v35 }
0x12e0   :  { %v999_v41 = vmul.f32 %v996_v38, %v946_v15 }
0x133d   :  { %v1002_v37 = vpop.permute.xlu0 %1001 }
0x133e   :  { %v1004_v40 = vmul.f32 %v1002_v37, %v996_v38 }
0x1340   :  { %1006 = vrot.lane.b32.xlu1 %v1004_v40, %s1970_s24 }
0x13b2   :  { %v1007_v42 = vpop.permute.xlu1 %1006 }
0x13b3   :  { %v1009_v43 = vadd.f32 %v1007_v42, %v999_v41  ;;  %v823_v41 = vpop.f32.mrf.mxu3 }
0x13b4   :  { %v824_v42 = vadd.f32 %v2223_v0, %v823_v41 }
0x13b5   :  { %1721 = vtanh.f32 %v1009_v43 }
0x13bb   :  { %v1722_v44 = vpop.eup %1721 }
0x13bc   :  { %1012 = vrot.lane.b32.xlu2 %v1722_v44, %s1971_s23 }
0x1416   :  { %v1013_v45 = vpop.permute.xlu2 %1012 }
0x1417   :  { %v1015_v46 = vmul.f32 %v1013_v45, %v996_v38 }
0x1419   :  { %1017 = vrot.lane.b32.xlu0 %v1015_v46, %s1972_s2 }
0x148b   :  { %v1018_v47 = vpop.permute.xlu0 %1017 }
0x148c   :  { %1605 = vmatmul.msk.f32.vlgmr.msra.gmra.mxu2 %vm229_vm5, %v1018_v47 }
0x148d   :  { %1287 = vmatpush.msra.mxu2 %v2203_v56 }
0x148f   :  { %1288 = vmatpush.msra.mxu2 %v2205_v57 }
0x150f   :  { %v1038_v50 = vpop.f32.mrf.mxu2 }
0x1510   :  { %v1041_v51 = vadd.f32 %v1038_v50, %v818_v49 }
0x1512   :  { %1723 = vtanh.f32 %v1041_v51  ;;  %v1606_v54 = vmul.f32 -1.442695, %v1041_v51 }
0x1514   :  { %1725 = vpow2.f32 %v1606_v54  ;;  %v226_v54 = vpop.f32.mrf.mxu0 }
0x1518   :  { %v1724_v52 = vpop.eup %1723 }
0x1519   :  { %1064 = vrot.lane.b32.xlu1 %v1724_v52, %s1969_s22 }
0x151a   :  { %v1726_v55 = vpop.eup %1725 }
0x151b   :  { %v1045_v58 = vadd.f32 1.0, %v1726_v55 }
0x151d   :  { %1727 = vrcp.f32 %v1045_v58  ;;  %v1057_v57 = vand.u32 2147483648, %v1045_v58  ;;  %vm1051_vm15 = vweird.f32 %v1045_v58  ;;  %v1055_v63 = vand.u32 2147483647, %v1045_v58 }
0x151f   :  { %v1058_v2 = vor.u32 1.1754944e-38, %v1057_v57  ;;  %vm1056_vm2 = vcmp.eq.f32.partialorder %v1055_v63, 8.507059e+37 }
0x1523   :  { %v1728_v59 = vpop.eup %1727 }
0x1524   :  { %v1047_v60 = vmul.f32 %v1728_v59, %v1045_v58  ;;  %vm1052_vm14 = vweird.f32 %v1728_v59 }
0x1525   :  { %vm1053_vm1 = vmor %vm1051_vm15, %vm1052_vm14 }
0x1526   :  { %v1048_v61 = vsub.f32 1.0, %v1047_v60  ;;  %v1781_v60 = vld [vmem:[%s2374_s3] ss:$0 sm:$0xff] }
0x1528   :  { %v1049_v56 = vmul.f32 %v1728_v59, %v1048_v61  ;;  %v227_v61 = vadd.f32 %v1781_v60, %v226_v54 }
0x152a   :  { %v1050_v62 = vadd.f32 %v1728_v59, %v1049_v56  ;;  %v708_v57 = vadd.f32 %v2250_v53, %v227_v61 }
0x152c   :  { %v1054_v1 = vsel %vm1053_vm1, %v1728_v59, %v1050_v62 }
0x152d   :  { %v1059_v4 = vsel %vm1056_vm2, %v1058_v2, %v1054_v1 }
0x152e   :  { %v1062_v7 = vmul.f32 %v1059_v4, %v1009_v43 }
0x158b   :  { %v1065_v3 = vpop.permute.xlu1 %1064 }
0x158c   :  { %v1067_v6 = vmul.f32 %v1065_v3, %v1059_v4 }
0x158e   :  { %1069 = vrot.lane.b32.xlu2 %v1067_v6, %s1970_s24 }
0x15e8   :  { %v1070_v5 = vpop.permute.xlu2 %1069 }
0x15e9   :  { %v1072_v8 = vadd.f32 %v1070_v5, %v1062_v7 }
0x15eb   :  { %1729 = vtanh.f32 %v1072_v8 }
0x15f1   :  { %v1730_v9 = vpop.eup %1729 }
0x15f2   :  { %1075 = vrot.lane.b32.xlu0 %v1730_v9, %s1971_s23 }
0x1664   :  { %v1076_v10 = vpop.permute.xlu0 %1075 }
0x1665   :  { %v1078_v11 = vmul.f32 %v1076_v10, %v1059_v4 }
0x1667   :  { %1080 = vrot.lane.b32.xlu1 %v1078_v11, %s1972_s2 }
0x16d9   :  { %v1081_v12 = vpop.permute.xlu1 %1080 }
0x16da   :  { %1607 = vmatmul.msk.f32.vlgmr.msrb.gmra.mxu1 %vm229_vm5, %v1081_v12 }
0x1757   :  { %v1101_v15 = vpop.f32.mrf.mxu1 }
0x1758   :  { %v1104_v16 = vadd.f32 %v1101_v15, %v821_v14 }
0x175a   :  { %1731 = vtanh.f32 %v1104_v16  ;;  %v1608_v18 = vmul.f32 -1.442695, %v1104_v16 }
0x175c   :  { %1733 = vpow2.f32 %v1608_v18 }
0x1760   :  { %v1732_v17 = vpop.eup %1731 }
0x1761   :  { %1127 = vrot.lane.b32.xlu2 %v1732_v17, %s1969_s22 }
0x1762   :  { %v1734_v19 = vpop.eup %1733 }
0x1763   :  { %v1108_v20 = vadd.f32 1.0, %v1734_v19 }
0x1765   :  { %1735 = vrcp.f32 %v1108_v20  ;;  %v1120_v26 = vand.u32 2147483648, %v1108_v20  ;;  %vm1114_vm4 = vweird.f32 %v1108_v20  ;;  %v1118_v27 = vand.u32 2147483647, %v1108_v20 }
0x1767   :  { %v1121_v29 = vor.u32 1.1754944e-38, %v1120_v26  ;;  %vm1119_vm7 = vcmp.eq.f32.partialorder %v1118_v27, 8.507059e+37 }
0x176b   :  { %v1736_v21 = vpop.eup %1735 }
0x176c   :  { %v1110_v22 = vmul.f32 %v1736_v21, %v1108_v20  ;;  %vm1115_vm3 = vweird.f32 %v1736_v21 }
0x176d   :  { %vm1116_vm6 = vmor %vm1114_vm4, %vm1115_vm3 }
0x176e   :  { %v1111_v23 = vsub.f32 1.0, %v1110_v22 }
0x1770   :  { %v1112_v24 = vmul.f32 %v1736_v21, %v1111_v23 }
0x1772   :  { %v1113_v25 = vadd.f32 %v1736_v21, %v1112_v24 }
0x1774   :  { %v1117_v28 = vsel %vm1116_vm6, %v1736_v21, %v1113_v25  ;;  %v826_v25 = vpop.f32.mrf.mxu3 }
0x1775   :  { %v1122_v31 = vsel %vm1119_vm7, %v1121_v29, %v1117_v28  ;;  %v827_v26 = vadd.f32 %v2223_v0, %v826_v25 }
0x1776   :  { %v1125_v33 = vmul.f32 %v1122_v31, %v1072_v8  ;;  %v1591_v8 = vmul.f32 -1.442695, %v708_v57 }
0x17bb   :  { %v1128_v30 = vpop.permute.xlu2 %1127 }
0x17bc   :  { %v1130_v32 = vmul.f32 %v1128_v30, %v1122_v31 }
0x17be   :  { %1132 = vrot.lane.b32.xlu0 %v1130_v32, %s1970_s24 }
0x1830   :  { %v1133_v34 = vpop.permute.xlu0 %1132 }
0x1831   :  { %v1135_v35 = vadd.f32 %v1133_v34, %v1125_v33 }
0x1833   :  { %1737 = vtanh.f32 %v1135_v35 }
0x1839   :  { %v1738_v36 = vpop.eup %1737 }
0x183a   :  { %1138 = vrot.lane.b32.xlu1 %v1738_v36, %s1971_s23 }
0x18ac   :  { %v1139_v37 = vpop.permute.xlu1 %1138 }
0x18ad   :  { %v1141_v38 = vmul.f32 %v1139_v37, %v1122_v31 }
0x18af   :  { %1143 = vrot.lane.b32.xlu2 %v1141_v38, %s1972_s2 }
0x1909   :  { %v1144_v40 = vpop.permute.xlu2 %1143 }
0x190a   :  { %1609 = vmatmul.msk.f32.vlgmr.msrb.gmra.mxu2 %vm229_vm5, %v1144_v40 }
0x198d   :  { %v1164_v43 = vpop.f32.mrf.mxu2 }
0x198e   :  { %v1167_v44 = vadd.f32 %v1164_v43, %v824_v42 }
0x1990   :  { %1739 = vtanh.f32 %v1167_v44  ;;  %v1610_v46 = vmul.f32 -1.442695, %v1167_v44 }
0x1992   :  { %1741 = vpow2.f32 %v1610_v46 }
0x1996   :  { %v1740_v45 = vpop.eup %1739 }
0x1997   :  { %1190 = vrot.lane.b32.xlu0 %v1740_v45, %s1969_s22 }
0x1998   :  { %v1742_v47 = vpop.eup %1741 }
0x1999   :  { %v1171_v48 = vadd.f32 1.0, %v1742_v47 }
0x199b   :  { %1743 = vrcp.f32 %v1171_v48  ;;  %v1183_v58 = vand.u32 2147483648, %v1171_v48  ;;  %vm1177_vm9 = vweird.f32 %v1171_v48  ;;  %v1181_v59 = vand.u32 2147483647, %v1171_v48 }
0x199c   :  { %1745 = vtanh.f32 %v708_v57 }
0x199d   :  { %v1184_v62 = vor.u32 1.1754944e-38, %v1183_v58  ;;  %vm1182_vm11 = vcmp.eq.f32.partialorder %v1181_v59, 8.507059e+37 }
0x19a1   :  { %v1744_v49 = vpop.eup %1743 }
0x19a2   :  { %v1173_v50 = vmul.f32 %v1744_v49, %v1171_v48  ;;  %vm1178_vm8 = vweird.f32 %v1744_v49  ;;  %v1746_v3 = vpop.eup %1745 }
0x19a3   :  { %vm1179_vm10 = vmor %vm1177_vm9, %vm1178_vm8 }
0x19a4   :  { %v1174_v51 = vsub.f32 1.0, %v1173_v50 }
0x19a6   :  { %v1175_v52 = vmul.f32 %v1744_v49, %v1174_v51 }
0x19a8   :  { %v1176_v55 = vadd.f32 %v1744_v49, %v1175_v52 }
0x19aa   :  { %v1180_v56 = vsel %vm1179_vm10, %v1744_v49, %v1176_v55  ;;  %vm1344_vm10 = vcmask 261120  }
0x19ab   :  { %v1185_v1 = vsel %vm1182_vm11, %v1184_v62, %v1180_v56  ;;  %vm1381_vm11 = vcmask 523264  }
0x19ac   :  { %v1188_v4 = vmul.f32 %v1185_v1, %v1135_v35 }
0x1a09   :  { %v1191_v63 = vpop.permute.xlu0 %1190 }
0x1a0a   :  { %v1193_v2 = vmul.f32 %v1191_v63, %v1185_v1 }
0x1a0c   :  { %1195 = vrot.lane.b32.xlu1 %v1193_v2, %s1970_s24 }
0x1a14   :  { %731 = vrot.lane.b32.xlu1 %v1746_v3, %s1969_s22 }
0x1a7e   :  { %v1196_v6 = vpop.permute.xlu1 %1195 }
0x1a7f   :  { %v2288_v7 = vadd.f32 %v1196_v6, %v1188_v4 }
0x1a81   :  { %1747 = vtanh.f32 %v2288_v7 }
0x1a82   :  { %1749 = vpow2.f32 %v1591_v8 }
0x1a86   :  { %v732_v21 = vpop.permute.xlu1 %731 }
0x1a87   :  { %v1748_v5 = vpop.eup %1747 }
0x1a88   :  { %1201 = vrot.lane.b32.xlu2 %v1748_v5, %s1971_s23  ;;  %v1750_v53 = vpop.eup %1749 }
0x1a89   :  { %v712_v9 = vadd.f32 1.0, %v1750_v53 }
0x1a8b   :  { %1751 = vrcp.f32 %v712_v9  ;;  %v724_v17 = vand.u32 2147483648, %v712_v9  ;;  %vm718_vm13 = vweird.f32 %v712_v9  ;;  %v722_v18 = vand.u32 2147483647, %v712_v9 }
0x1a8d   :  { %v725_v20 = vor.u32 1.1754944e-38, %v724_v17  ;;  %vm723_vm15 = vcmp.eq.f32.partialorder %v722_v18, 8.507059e+37 }
0x1a91   :  { %v1752_v10 = vpop.eup %1751 }
0x1a92   :  { %v714_v11 = vmul.f32 %v1752_v10, %v712_v9  ;;  %vm719_vm12 = vweird.f32 %v1752_v10 }
0x1a93   :  { %vm720_vm14 = vmor %vm718_vm13, %vm719_vm12 }
0x1a94   :  { %v715_v12 = vsub.f32 1.0, %v714_v11 }
0x1a96   :  { %v716_v13 = vmul.f32 %v1752_v10, %v715_v12 }
0x1a98   :  { %v717_v15 = vadd.f32 %v1752_v10, %v716_v13 }
0x1a9a   :  { %v721_v19 = vsel %vm720_vm14, %v1752_v10, %v717_v15  ;;  %vm1543_vm14 = vcmask 31744  }
0x1a9b   :  { %v726_v22 = vsel %vm723_vm15, %v725_v20, %v721_v19  ;;  %v1339_v20 = vld [vmem:[#allocation9 + $0x18] sm:$0xff]  ;;  %vm1546_vm15 = vcmask 97280  }
0x1a9c   :  { %v734_v23 = vmul.f32 %v732_v21, %v726_v22  ;;  %v729_v30 = vmul.f32 %v726_v22, %v2231_v39  ;;  %v1338_v21 = vld [vmem:[#allocation9 + $0x10] sm:$0xff]  ;;  %1360 = vmatpush.msrb.mxu1 %v1339_v20 }
0x1a9e   :  { %1361 = vmatpush.msrb.mxu1 %v1338_v21 }
0x1ae2   :  { %v1202_v14 = vpop.permute.xlu2 %1201 }
0x1ae3   :  { %v1204_v16 = vmul.f32 %v1202_v14, %v1185_v1 }
0x1ae5   :  { %1206 = vrot.lane.b32.xlu0 %v1204_v16, %s1972_s2 }
0x1aed   :  { %736 = vrot.lane.b32.xlu0 %v734_v23, %s1970_s24  ;;  %v1336_v23 = vld [vmem:[#allocation9] sm:$0xff] }
0x1b57   :  { %v1207_v24 = vpop.permute.xlu0 %1206 }
0x1b58   :  { %1611 = vmatmul.msk.f32.vlgmr.msra.gmra.mxu1 %vm229_vm5, %v1207_v24 }
0x1b5f   :  { %v737_v29 = vpop.permute.xlu0 %736 }
0x1b60   :  { %v739_v31 = vadd.f32 %v737_v29, %v729_v30  ;;  %v1373_v29 = vld [vmem:[#allocation11 + $0x20] sm:$0xff]  ;;  %v1372_v30 = vld [vmem:[#allocation11 + $0x18] sm:$0xff] }
0x1bd5   :  { %v1227_v27 = vpop.f32.mrf.mxu1 }
0x1bd6   :  { %v1230_v28 = vadd.f32 %v1227_v27, %v827_v26  ;;  %v1376_v26 = vld [vmem:[#allocation11 + $0x38] sm:$0xff]  ;;  %v1375_v27 = vld [vmem:[#allocation11 + $0x30] sm:$0xff] }
0x1bd7   :  { %1393 = vmatpush.msrb.mxu0 %v1376_v26 }
0x1bd8   :  { %1753 = vtanh.f32 %v1230_v28  ;;  %v1612_v34 = vmul.f32 -1.442695, %v1230_v28  ;;  %v1374_v28 = vld [vmem:[#allocation11 + $0x28] sm:$0xff] }
0x1bd9   :  { %1755 = vtanh.f32 %v739_v31  ;;  %1394 = vmatpush.msrb.mxu0 %v1375_v27  ;;  %v1371_v31 = vld [vmem:[#allocation11 + $0x10] sm:$0xff] }
0x1bda   :  { %1757 = vpow2.f32 %v1612_v34 }
0x1bdb   :  { %1395 = vmatpush.msrb.mxu0 %v1374_v28 }
0x1bdd   :  { %1396 = vmatpush.msrb.mxu0 %v1373_v29 }
0x1bde   :  { %v1754_v32 = vpop.eup %1753 }
0x1bdf   :  { %1253 = vrot.lane.b32.xlu2 %v1754_v32, %s1969_s22  ;;  %v1756_v33 = vpop.eup %1755  ;;  %1397 = vmatpush.msrb.mxu0 %v1372_v30  ;;  %v1370_v32 = vld [vmem:[#allocation11 + $0x8] sm:$0xff] }
0x1be0   :  { %v1758_v35 = vpop.eup %1757 }
0x1be1   :  { %v1234_v36 = vadd.f32 1.0, %v1758_v35  ;;  %1398 = vmatpush.msrb.mxu0 %v1371_v31 }
0x1be3   :  { %1759 = vrcp.f32 %v1234_v36  ;;  %v1246_v39 = vand.u32 2147483648, %v1234_v36  ;;  %vm1240_vm2 = vweird.f32 %v1234_v36  ;;  %v1244_v43 = vand.u32 2147483647, %v1234_v36  ;;  %1399 = vmatpush.msrb.mxu0 %v1370_v32 }
0x1be5   :  { %v1247_v45 = vor.u32 1.1754944e-38, %v1246_v39  ;;  %vm1245_vm4 = vcmp.eq.f32.partialorder %v1244_v43, 8.507059e+37 }
0x1be7   :  { %742 = vrot.lane.b32.xlu2 %v1756_v33, %s1971_s23  ;;  %v1369_v33 = vld [vmem:[#allocation11] sm:$0xff] }
0x1be8   :  { %1400 = vmatpush.msrb.mxu0 %v1369_v33 }
0x1be9   :  { %v1760_v37 = vpop.eup %1759 }
0x1bea   :  { %v1236_v38 = vmul.f32 %v1760_v37, %v1234_v36  ;;  %vm1241_vm1 = vweird.f32 %v1760_v37  ;;  %v1413_v36 = vld [vmem:[#allocation12 + $0x38] sm:$0xff] }
0x1beb   :  { %vm1242_vm3 = vmor %vm1240_vm2, %vm1241_vm1  ;;  %1429 = vmatpush.msrb.mxu2 %v1413_v36 }
0x1bec   :  { %v1237_v40 = vsub.f32 1.0, %v1236_v38  ;;  %v1411_v38 = vld [vmem:[#allocation12 + $0x28] sm:$0xff] }
0x1bee   :  { %v1238_v41 = vmul.f32 %v1760_v37, %v1237_v40  ;;  %v1410_v40 = vld [vmem:[#allocation12 + $0x20] sm:$0xff] }
0x1bf0   :  { %v1239_v42 = vadd.f32 %v1760_v37, %v1238_v41  ;;  %v1409_v41 = vld [vmem:[#allocation12 + $0x18] sm:$0xff] }
0x1bf2   :  { %v1243_v44 = vsel %vm1242_vm3, %v1760_v37, %v1239_v42  ;;  %v1412_v37 = vld [vmem:[#allocation12 + $0x30] sm:$0xff] }
0x1bf3   :  { %v1248_v47 = vsel %vm1245_vm4, %v1247_v45, %v1243_v44  ;;  %1430 = vmatpush.msrb.mxu2 %v1412_v37  ;;  %v1639_v42 = vld [vmem:[%s2379_s8] ss:$0 sm:$0xff] }
0x1bf4   :  { %v1251_v51 = vmul.f32 %v1248_v47, %v2288_v7  ;;  %v1408_v45 = vld [vmem:[#allocation12 + $0x10] sm:$0xff] }
0x1bf5   :  { %1431 = vmatpush.msrb.mxu2 %v1411_v38 }
0x1bf7   :  { %1432 = vmatpush.msrb.mxu2 %v1410_v40 }
0x1bf9   :  { %1433 = vmatpush.msrb.mxu2 %v1409_v41 }
0x1bfb   :  { %1434 = vmatpush.msrb.mxu2 %v1408_v45 }
0x1c39   :  { %v1254_v46 = vpop.permute.xlu2 %1253 }
0x1c3a   :  { %v1256_v48 = vmul.f32 %v1254_v46, %v1248_v47  ;;  %v1407_v46 = vld [vmem:[#allocation12 + $0x8] sm:$0xff] }
0x1c3b   :  { %1435 = vmatpush.msrb.mxu2 %v1407_v46 }
0x1c3c   :  { %1258 = vrot.lane.b32.xlu1 %v1256_v48, %s1970_s24  ;;  %v1449_v48 = vld [vmem:[%s2384_s13 + $0x38] sm:$0xff] }
0x1c41   :  { %v743_v49 = vpop.permute.xlu2 %742 }
0x1c42   :  { %v745_v50 = vmul.f32 %v743_v49, %v726_v22  ;;  %v1337_v22 = vld [vmem:[#allocation9 + $0x8] sm:$0xff]  ;;  %v1448_v49 = vld [vmem:[%s2384_s13 + $0x30] sm:$0xff] }
0x1c43   :  { %1362 = vmatpush.msrb.mxu1 %v1337_v22 }
0x1c44   :  { %747 = vrot.lane.b32.xlu1 %v745_v50, %s1972_s2  ;;  %v1447_v50 = vld [vmem:[%s2384_s13 + $0x28] sm:$0xff] }
0x1c45   :  { %1363 = vmatpush.msrb.mxu1 %v1336_v23 }
0x1c47   :  { %1465 = vmatpush.msra.mxu1 %v1449_v48 }
0x1c49   :  { %1466 = vmatpush.msra.mxu1 %v1448_v49 }
0x1c4b   :  { %1467 = vmatpush.msra.mxu1 %v1447_v50 }
0x1cae   :  { %v1259_v52 = vpop.permute.xlu1 %1258 }
0x1caf   :  { %v1261_v54 = vadd.f32 %v1259_v52, %v1251_v51  ;;  %v1446_v51 = vld [vmem:[%s2384_s13 + $0x20] sm:$0xff]  ;;  %v1445_v52 = vld [vmem:[%s2384_s13 + $0x18] sm:$0xff] }
0x1cb0   :  { %1468 = vmatpush.msra.mxu1 %v1446_v51 }
0x1cb1   :  { %1761 = vtanh.f32 %v1261_v54 }
0x1cb2   :  { %1469 = vmatpush.msra.mxu1 %v1445_v52 }
0x1cb6   :  { %v2302_v55 = vpop.permute.xlu1 %747 }
0x1cb7   :  { %v1762_v58 = vpop.eup %1761  ;;  %750 = vst.msk [vmem:[#allocation2 + $0x38] sm:$0xff] %vm229_vm5, %v2302_v55 }
0x1cb8   :  { %1264 = vrot.lane.b32.xlu0 %v1762_v58, %s1971_s23 }
0x1cbe   :  { %v761_v59 = vld [vmem:[#allocation2 + $0x38] sm:$0xff] }
0x1cbf   :  { %1599 = vmatmul.msk.f32.gmra.mxu3 %vm229_vm5, %v761_v59 }
0x1d2a   :  { %v1265_v60 = vpop.permute.xlu0 %1264 }
0x1d2b   :  { %v1267_v61 = vmul.f32 %v1265_v60, %v1248_v47  ;;  %v1406_v47 = vld [vmem:[#allocation12] sm:$0xff] }
0x1d2c   :  { %1436 = vmatpush.msrb.mxu2 %v1406_v47  ;;  %v1444_v60 = vld [vmem:[%s2384_s13 + $0x10] sm:$0xff] }
0x1d2d   :  { %1269 = vrot.lane.b32.xlu2 %v1267_v61, %s1972_s2  ;;  %1470 = vmatpush.msra.mxu1 %v1444_v60  ;;  %v1443_v61 = vld [vmem:[%s2384_s13 + $0x8] sm:$0xff] }
0x1d2f   :  { %1471 = vmatpush.msra.mxu1 %v1443_v61 }
0x1d42   :  { %v829_v62 = vpop.f32.mrf.mxu3 }
0x1d43   :  { %v830_v57 = vadd.f32 %v2223_v0, %v829_v62  ;;  %v1481_v62 = vld [vmem:[%s2386_s15] sm:$0xff] }
0x1d87   :  { %v1270_v56 = vpop.permute.xlu2 %1269 }
0x1d88   :  { %1613 = vmatmul.msk.f32.vlgmr.msra.gmra.mxu2 %vm229_vm5, %v1270_v56  ;;  %v1442_v56 = vld [vmem:[%s2384_s13] sm:$0xff]  ;;  %s1974_s13 = smov 124  }
0x1d89   :  { %1472 = vmatpush.msra.mxu1 %v1442_v56 }
0x1e0b   :  { %v1290_v63 = vpop.f32.mrf.mxu2 }
0x1e0c   :  { %v1293_v1 = vadd.f32 %v1290_v63, %v830_v57  ;;  %v1641_v57 = vld [vmem:[%s2383_s12] ss:$0 sm:$0xff]  ;;  %s1975_s12 = smov 12  }
0x1e0e   :  { %1763 = vtanh.f32 %v1293_v1  ;;  %v1614_v3 = vmul.f32 -1.442695, %v1293_v1 }
0x1e10   :  { %1765 = vpow2.f32 %v1614_v3  ;;  %v1642_v3 = vld [vmem:[%s2385_s14] ss:$0 sm:$0xff]  ;;  %s1976_s14 = smov [#allocation14]  }
0x1e11   :  { %s1554_s15 = sshll.u32 %s1976_s14, 4  ;;  %s1555_s15 = int_to_ptr.vmem [resolvable:$true] %s1554_s15 }
0x1e14   :  { %v1764_v2 = vpop.eup %1763 }
0x1e15   :  { %1316 = vrot.lane.b32.xlu0 %v1764_v2, %s1969_s22 }
0x1e16   :  { %v1766_v4 = vpop.eup %1765 }
0x1e17   :  { %v1297_v6 = vadd.f32 1.0, %v1766_v4 }
0x1e19   :  { %1767 = vrcp.f32 %v1297_v6  ;;  %v1309_v10 = vand.u32 2147483648, %v1297_v6  ;;  %vm1303_vm7 = vweird.f32 %v1297_v6  ;;  %v1307_v0 = vand.u32 2147483647, %v1297_v6 }
0x1e1b   :  { %v1310_v12 = vor.u32 1.1754944e-38, %v1309_v10  ;;  %vm1308_vm9 = vcmp.eq.f32.partialorder %v1307_v0, 8.507059e+37 }
0x1e1f   :  { %v1768_v7 = vpop.eup %1767 }
0x1e20   :  { %v1299_v5 = vmul.f32 %v1768_v7, %v1297_v6  ;;  %vm1304_vm6 = vweird.f32 %v1768_v7 }
0x1e21   :  { %vm1305_vm8 = vmor %vm1303_vm7, %vm1304_vm6 }
0x1e22   :  { %v1300_v8 = vsub.f32 1.0, %v1299_v5 }
0x1e24   :  { %v1301_v53 = vmul.f32 %v1768_v7, %v1300_v8 }
0x1e26   :  { %v1302_v9 = vadd.f32 %v1768_v7, %v1301_v53 }
0x1e28   :  { %v1306_v11 = vsel %vm1305_vm8, %v1768_v7, %v1302_v9 }
0x1e29   :  { %v1311_v14 = vsel %vm1308_vm9, %v1310_v12, %v1306_v11 }
0x1e2a   :  { %v1314_v16 = vmul.f32 %v1311_v14, %v1261_v54  ;;  %v1640_v54 = vld [vmem:[%s2381_s10] ss:$0 sm:$0xff] }
0x1e87   :  { %v1317_v13 = vpop.permute.xlu0 %1316 }
0x1e88   :  { %v1319_v15 = vmul.f32 %v1317_v13, %v1311_v14 }
0x1e8a   :  { %1321 = vrot.lane.b32.xlu1 %v1319_v15, %s1970_s24 }
0x1e92   :  { %1483 = vrot.lane.b32.xlu1 %v1481_v62, %s1973_s1 }
0x1efc   :  { %v1322_v17 = vpop.permute.xlu1 %1321 }
0x1efd   :  { %v1324_v18 = vadd.f32 %v1322_v17, %v1314_v16 }
0x1eff   :  { %1769 = vtanh.f32 %v1324_v18 }
0x1f04   :  { %v1484_v10 = vpop.permute.xlu1 %1483 }
0x1f05   :  { %v1770_v19 = vpop.eup %1769 }
0x1f06   :  { %1327 = vrot.lane.b32.xlu2 %v1770_v19, %s1971_s23  ;;  %s1556_s23 = sshll.u32 %s2387_s16, 4  ;;  %s1557_s23 = int_to_ptr.hbm [resolvable:$true] %s1556_s23 }
0x1f60   :  { %v1328_v24 = vpop.permute.xlu2 %1327 }
0x1f61   :  { %v1330_v25 = vmul.f32 %v1328_v24, %v1311_v14 }
0x1f63   :  { %1332 = vrot.lane.b32.xlu0 %v1330_v25, %s1969_s22 }
0x1fd5   :  { %v1333_v34 = vpop.permute.xlu0 %1332 }
0x1fd6   :  { %v1335_v35 = vsel %vm229_vm5, %v2302_v55, %v1333_v34 }
0x1fd7   :  { %1615 = vmatmul.msk.f32.vlgmr.msrb.gmra.mxu1 %vm1344_vm10, %v1335_v35 }
0x2054   :  { %v1365_v39 = vpop.f32.mrf.mxu1 }
0x2055   :  { %v1366_v43 = vadd.f32 %v1639_v42, %v1365_v39 }
0x2057   :  { %v1368_v44 = vmax.f32 %v1366_v43, 0.0 }
0x2059   :  { %1616 = vmatmul.msk.f32.vlgmr.msrb.gmra.mxu0 %vm1381_vm11, %v1368_v44 }
0x20d6   :  { %v1402_v55 = vpop.f32.mrf.mxu0 }
0x20d7   :  { %v1403_v58 = vadd.f32 %v1640_v54, %v1402_v55 }
0x20d9   :  { %v1405_v59 = vmax.f32 %v1403_v58, 0.0 }
0x20db   :  { %1617 = vmatmul.msk.f32.vlgmr.msrb.gmra.mxu2 %vm1381_vm11, %v1405_v59 }
0x215e   :  { %v1438_v63 = vpop.f32.mrf.mxu2 }
0x215f   :  { %v1439_v1 = vadd.f32 %v1641_v57, %v1438_v63 }
0x2161   :  { %v1441_v2 = vmax.f32 %v1439_v1, 0.0 }
0x2163   :  { %1618 = vmatmul.msk.f32.vlgmr.msra.gmra.mxu1 %vm1381_vm11, %v1441_v2 }
0x21e0   :  { %v1474_v4 = vpop.f32.mrf.mxu1 }
0x21e1   :  { %v2359_v6 = vadd.f32 %v1642_v3, %v1474_v4 }
0x21e3   :  { %v1477_v7 = vmax.f32 %v2359_v6, -20.0 }
0x21e5   :  { %v1478_v5 = vmin.f32 %v1477_v7, 2.0 }
0x21e7   :  { %1506 = vrot.lane.b32.xlu1 %v1478_v5, %s1974_s13  ;;  %v1495_v8 = vsub.f32 0.0, %v1478_v5  ;;  %v1479_v53 = vmul.f32 1.442695, %v1478_v5 }
0x21e9   :  { %v1496_v9 = vmul.f32 1.442695, %v1495_v8  ;;  %1771 = vpow2.f32 %v1479_v53 }
0x21eb   :  { %1773 = vpow2.f32 %v1496_v9 }
0x21ef   :  { %v1772_v0 = vpop.eup %1771 }
0x21f0   :  { %v1486_v11 = vmul.f32 %v1772_v0, %v1484_v10  ;;  %v1544_v47 = vsel %vm1543_vm14, %v2359_v6, %v1772_v0 }
0x21f1   :  { %v1774_v12 = vpop.eup %1773 }
0x21f2   :  { %1499 = vrot.lane.b32.xlu0 %v1774_v12, %s1974_s13  ;;  %1488 = vrot.lane.b32.xlu2 %v1486_v11, %s1974_s13 }
0x224c   :  { %v1489_v13 = vpop.permute.xlu2 %1488 }
0x224d   :  { %v1491_v14 = vadd.f32 %v1489_v13, %v2359_v6 }
0x224f   :  { %v1512_v15 = vmul.f32 -2.0, %v1491_v14  ;;  %1775 = vtanh.f32 %v1491_v14  ;;  %v1493_v22 = vperm.slane %v1491_v14, 0  ;;  %v1511_v37 = vsub.f32 0.6931472, %v1491_v14 }
0x2251   :  { %v1516_v16 = vand.u32 2147483647, %v1512_v15  ;;  %v1494_v24 = vsub.f32 %v1493_v22, %v2359_v6  ;;  %v1513_v33 = vmax.f32 %v1512_v15, 0.0  ;;  %vm1514_vm13 = vcmp.ne.f32.partialorder %v1512_v15, %v1512_v15 }
0x2253   :  { %v1517_v17 = vsub.f32 0.0, %v1516_v16 }
0x2255   :  { %v1776_v18 = vpop.eup %1775  ;;  %v1518_v19 = vmul.f32 1.442695, %v1517_v17 }
0x2256   :  { %1536 = vrot.lane.b32.xlu2 %v1776_v18, %s1962_s30 }
0x2257   :  { %1777 = vpow2.f32 %v1518_v19 }
0x2259   :  { %v1507_v38 = vpop.permute.xlu1 %1506 }
0x225d   :  { %v1778_v20 = vpop.eup %1777 }
0x225e   :  { %v1520_v21 = vadd.f32 1.0, %v1778_v20  ;;  %v1523_v23 = vmul.f32 -0.5, %v1778_v20  ;;  %v1526_v27 = vand.u32 2147483647, %v1778_v20 }
0x2260   :  { %1779 = vlog2.f32 %v1520_v21  ;;  %v1524_v25 = vadd.f32 1.0, %v1523_v23  ;;  %vm1527_vm12 = vcmp.lt.f32.partialorder %v1526_v27, 0.0004427343 }
0x2262   :  { %v1525_v32 = vmul.f32 %v1778_v20, %v1524_v25 }
0x2264   :  { %v1500_v26 = vpop.permute.xlu0 %1499 }
0x2265   :  { %v1502_v28 = vmul.f32 %v1500_v26, %v1494_v24 }
0x2266   :  { %v1780_v29 = vpop.eup %1779 }
0x2267   :  { %v1503_v30 = vmul.f32 -0.5, %v1502_v28  ;;  %v1522_v31 = vmul.f32 0.6931472, %v1780_v29 }
0x2269   :  { %v1504_v34 = vmul.f32 %v1503_v30, %v1502_v28  ;;  %v1528_v35 = vsel %vm1527_vm12, %v1525_v32, %v1522_v31 }
0x226a   :  { %v1529_v36 = vadd.f32 %v1528_v35, %v1513_v33 }
0x226b   :  { %v1509_v41 = vsub.f32 %v1504_v34, %v1507_v38 }
0x226c   :  { %v1530_v40 = vsel %vm1514_vm13, %v1512_v15, %v1529_v36 }
0x226d   :  { %v1531_v42 = vsub.f32 %v1511_v37, %v1530_v40  ;;  %v1619_v43 = vadd.f32 -0.9189385, %v1509_v41 }
0x226f   :  { %v1532_v39 = vmul.f32 2.0, %v1531_v42 }
0x2271   :  { %v1533_v44 = vperm.slane %v1532_v39, 0 }
0x2273   :  { %v1534_v45 = vsub.f32 %v1619_v43, %v1533_v44 }
0x2275   :  { %1540 = vrot.lane.b32.xlu0 %v1534_v45, %s1975_s12 }
0x22b0   :  { %v1537_v46 = vpop.permute.xlu2 %1536 }
0x22b1   :  { %v1545_v48 = vsel %vm163_vm0, %v1544_v47, %v1537_v46 }
0x22e7   :  { %v1541_v49 = vpop.permute.xlu0 %1540 }
0x22e8   :  { %v1547_v50 = vsel %vm1546_vm15, %v1545_v48, %v1541_v49 }
0x22e9   :  { %1548 = vst.msk [vmem:[#allocation14] sm:$0xff] %vm229_vm5, %v1547_v50 }
0x22ea   :  { %1559 = dma.vmem_to_hbm [thread:$0]  %s1555_s15, 128, %s1557_s23, [#allocation5]  }
0x22eb   :  { %1958 = dma.done.wait [#allocation5], 128  }
0x22ec   :  { %1959 = vsyncadd [#allocation5], 4294967168 }
0x22ed   :  { %1564 = vsyncpa [#allocation4], 1 }
0x22ee   :  { %1565 = vsyncpa [#allocation7], 1 }
0x22ef   :  { %1566 = vsyncpa [#allocation10], 1 }
0x22f0   :  { %1567 = vsyncpa [#allocation13], 1 }
0x22f1   :  { %1568 = vsyncpa [#allocation5], 1 }

</bundles_post_ra>
